<compile_context>
chip_gen: v5e
topology: v5e:2x2
jax: 0.10.0
libtpu: 0.0.40
codegen_flags: <defaults>
</compile_context>

<pallas_src>
import numpy as np
import jax
import jax.numpy as jnp
from jax.experimental import pallas as pl
from jax.experimental.pallas import tpu as pltpu


def _round_up(v: int, m: int) -> int:
    return (v + m - 1) // m * m


def _cv_gaussian_kernel_1d(ksize: int, sigma: float) -> np.ndarray:
    """OpenCV getGaussianKernel formula (sigma > 0 path)."""
    if sigma <= 0:
        sigma = 0.3 * ((ksize - 1) * 0.5 - 1) + 0.8
    x = np.arange(ksize, dtype=np.float64) - (ksize - 1) / 2.0
    k = np.exp(-(x * x) / (2.0 * sigma * sigma))
    return (k / k.sum()).astype(np.float64)


def _vmem_capacity_bytes() -> int:
    try:
        return int(pltpu.get_tpu_info().vmem_capacity_bytes)
    except Exception:
        return 64 * 1024 * 1024   # conservative (v7x per-TC VMEM)


_ROLL_OK = None


def _xlu_roll_available() -> bool:
    """One-shot probe: pltpu.roll compiles and matches np.roll semantics for the
    exact usage pattern below (3-D value, last axis multiple of 128, static
    positive shift).  Falls back to plain value slices if not."""
    global _ROLL_OK
    if _ROLL_OK is None:
        try:
            def k(x_ref, o_ref):
                o_ref[...] = pltpu.roll(x_ref[...], shift=128 - 3, axis=2)
            x = jnp.arange(2 * 8 * 128, dtype=jnp.float32).reshape(2, 8, 128)
            y = pl.pallas_call(
                k, out_shape=jax.ShapeDtypeStruct(x.shape, x.dtype))(x)
            _ROLL_OK = bool(np.array_equal(np.asarray(y),
                                           np.roll(np.asarray(x), 128 - 3, axis=2)))
        except Exception:
            _ROLL_OK = False
    return _ROLL_OK


def _make_blur_kernel(ky, kx, H, W, ph, pw, TH, out_dtype, use_roll):
    """Fused separable blur over a (PB, H, W) block, reflect-101 borders."""
    KH, KW = len(ky), len(kx)
    Wp = W + 2 * pw
    Wl = _round_up(Wp, 128)                       # lane-dense padded width
    is_int = np.issubdtype(np.dtype(out_dtype), np.integer)

    def load_rows(x_ref, lo, hi):
        """Rows [lo, hi) of the block with BORDER_REFLECT_101 along H, as f32.
        Reflected rows are built from values (no ref writes)."""
        segs = []
        for r in range(lo, min(hi, 0)):           # top halo: row -k -> row k
            src = -r
            segs.append(x_ref[:, src:src + 1, :])
        lo_i, hi_i = max(lo, 0), min(hi, H)
        if hi_i > lo_i:
            segs.append(x_ref[:, lo_i:hi_i, :])   # interior: one dense load
        for r in range(max(lo, H), hi):           # bottom halo: H-1+k -> H-1-k
            src = 2 * (H - 1) - r
            segs.append(x_ref[:, src:src + 1, :])
        segs = [s.astype(jnp.float32) for s in segs]
        return segs[0] if len(segs) == 1 else jnp.concatenate(segs, axis=1)

    def pad_cols(a):
        """Reflect-101 pad along W, extended to lane-dense width Wl (zeros)."""
        segs = []
        for c in range(pw, 0, -1):                # left halo cols: pw, ..., 1
            segs.append(a[:, :, c:c + 1])
        segs.append(a)
        for c in range(W, W + pw):                # right halo cols
            src = 2 * (W - 1) - c
            segs.append(a[:, :, src:src + 1])
        if Wl > Wp:
            segs.append(jnp.zeros(a.shape[:2] + (Wl - Wp,), jnp.float32))
        return segs[0] if len(segs) == 1 else jnp.concatenate(segs, axis=2)

    def h_tap(ah, j):
        if j == 0:
            return ah[:, :, 0:W]
        if use_roll:
            # XLU lane rotate + aligned offset-0 slice (no unaligned lane
            # extraction on the VPU/load path).  Never reads the zero-fill
            # lanes: j + W <= Wp <= Wl.
            return pltpu.roll(ah, shift=Wl - j, axis=2)[:, :, 0:W]
        return ah[:, :, j:j + W]

    def kernel(x_ref, o_ref):
        # Fused separable blur over row strips; intermediates stay as SSA
        # values (vregs / compiler-managed VMEM).  No padded scratch ref,
        # no full-plane acc_v writeback, no masked width-1 border stores.
        for r0 in range(0, H, TH):
            th = min(TH, H - r0)
            xs = load_rows(x_ref, r0 - ph, r0 + th + ph)      # (PB, th+2ph, W)
            # vertical taps (sublane-offset slices of a value)
            acc = jnp.float32(ky[0]) * xs[:, 0:th, :]
            for i in range(1, KH):
                acc = acc + jnp.float32(ky[i]) * xs[:, i:i + th, :]
            ah = pad_cols(acc)                                 # (PB, th, Wl)
            # horizontal taps
            out = jnp.float32(kx[0]) * h_tap(ah, 0)
            for j in range(1, KW):
                out = out + jnp.float32(kx[j]) * h_tap(ah, j)
            if is_int:
                out = jnp.round(out)              # cv2 rounds; don't truncate
            o_ref[:, r0:r0 + th, :] = out.astype(out_dtype)

    return kernel


def _choose_planes_per_block(P, per_plane_bytes, block_budget):
    """Largest divisor of P whose block fits the budget (no G>=2 constraint:
    v5e/v6e are single-TC, so fewer/bigger blocks win).  On v7x an even grid
    extent is preferable (2 TCs), but blocks already stay small vs capacity."""
    best = 1
    for d in range(1, P + 1):
        if P % d == 0 and d * per_plane_bytes <= block_budget:
            best = d
    return best


def gaussian_blur(img: jax.Array, kernel_size=(5, 5), std_dev: float = 1.0) -> jax.Array:
    """cv2.GaussianBlur(img, kernel_size, std_dev) for NCHW input."""
    N, C, H, W = img.shape
    kw_, kh_ = kernel_size                       # cv2 ksize is (width, height)
    assert kw_ % 2 == 1 and kh_ % 2 == 1, "kernel size must be odd"
    kx = _cv_gaussian_kernel_1d(kw_, float(std_dev))   # along width
    ky = _cv_gaussian_kernel_1d(kh_, float(std_dev))   # along height (sigmaY=sigmaX)
    ph, pw = kh_ // 2, kw_ // 2
    assert ph < H and pw < W, "kernel radius must be smaller than image dims"

    P = N * C
    itemsize = np.dtype(img.dtype).itemsize
    TH = H if H <= 256 else 128                  # in-kernel row-strip size

    # (8,128)-rounded VMEM accounting (layout-real sizes incl. f32 temporaries).
    H8, W128 = _round_up(H, 8), _round_up(W, 128)
    Wl = _round_up(W + 2 * pw, 128)
    TH8 = _round_up(min(TH, H), 8)
    THp8 = _round_up(min(TH, H) + 2 * ph, 8)
    io_plane = 2 * 2 * H8 * W128 * itemsize                    # dbl-buffered in+out
    tmp_plane = (THp8 * W128 + 4 * TH8 * max(W128, Wl)) * 4    # xs/acc/ah/roll/out f32
    per_plane = io_plane + tmp_plane

    cap = _vmem_capacity_bytes()
    block_budget = max(per_plane, cap // 8)      # ~8 MiB on v7x, ~16 MiB on v5e/v6e
    PB = _choose_planes_per_block(P, per_plane, block_budget)
    G = P // PB
    needed = PB * per_plane * 3 // 2 + (1 << 20)
    vmem_limit = int(min(int(cap * 0.85), max(needed, 32 << 20)))

    x = img.reshape(P, H, W)
    kernel = _make_blur_kernel(tuple(map(float, ky)), tuple(map(float, kx)),
                               H, W, ph, pw, TH, img.dtype, _xlu_roll_available())

    ce = pl.CostEstimate(
        flops=2 * P * H * W * (len(ky) + len(kx)),
        transcendentals=0,
        bytes_accessed=2 * P * H * W * itemsize)

    out = pl.pallas_call(
        kernel,
        out_shape=jax.ShapeDtypeStruct((P, H, W), img.dtype),
        grid_spec=pltpu.PrefetchScalarGridSpec(
            num_scalar_prefetch=0,
            grid=(G,),
            in_specs=[pl.BlockSpec((PB, H, W), lambda g: (g, 0, 0))],
            out_specs=pl.BlockSpec((PB, H, W), lambda g: (g, 0, 0)),
        ),
        compiler_params=pltpu.CompilerParams(
            dimension_semantics=("parallel",),
            vmem_limit_bytes=vmem_limit,
        ),
        cost_estimate=ce,
    )(x)
    return out.reshape(N, C, H, W)


def _reference_blur(img: np.ndarray, kernel_size, std_dev) -> np.ndarray:
    """Pure-numpy reference (same semantics) for correctness checking."""
    N, C, H, W = img.shape
    kw_, kh_ = kernel_size
    kx = _cv_gaussian_kernel_1d(kw_, std_dev)
    ky = _cv_gaussian_kernel_1d(kh_, std_dev)
    k2d = np.outer(ky, kx)
    ph, pw = kh_ // 2, kw_ // 2
    xp = np.pad(img.astype(np.float64), ((0, 0), (0, 0), (ph, ph), (pw, pw)),
                mode="reflect")
    out = np.zeros((N, C, H, W), dtype=np.float64)
    for i in range(kh_):
        for j in range(kw_):
            out += k2d[i, j] * xp[:, :, i:i + H, j:j + W]
    if np.issubdtype(img.dtype, np.integer):
        out = np.round(out)
    return out.astype(img.dtype)


if __name__ == "__main__":
    key = jax.random.PRNGKey(0)
    x = jax.random.uniform(key, (2, 4, 16, 16), dtype=jnp.float32)  # NCHW

    kernel_size = (5, 5)
    std_dev = 1.0

    y = gaussian_blur(x, kernel_size=kernel_size, std_dev=std_dev)
    y = jax.block_until_ready(y)

    y_ref = _reference_blur(np.asarray(x), kernel_size, std_dev)
    np.testing.assert_allclose(np.asarray(y), y_ref, rtol=1e-5, atol=1e-5)

    print("KERNEL_OK")
</pallas_src>

<mosaic_0001>
module attributes {stable_mosaic.version = 11 : i64} {
  func.func @k(%arg0: memref<2x8x128xf32, #tpu.memory_space<vmem>>, %arg1: memref<2x8x128xf32, #tpu.memory_space<vmem>>) attributes {dimension_semantics = [], scalar_prefetch = 0 : i64, scratch_operands = 0 : i64, tpu.core_type = #tpu.core_type<tc>} {
    %c0 = arith.constant 0 : index
    %c0_0 = arith.constant 0 : index
    %c0_1 = arith.constant 0 : index
    %0 = vector.load %arg0[%c0, %c0_0, %c0_1] : memref<2x8x128xf32, #tpu.memory_space<vmem>>, vector<2x8x128xf32>
    %c125_i32 = arith.constant 125 : i32
    %1 = tpu.dynamic_rotate %0 by %c125_i32 dim 2 : vector<2x8x128xf32>, i32 -> vector<2x8x128xf32>
    %c0_2 = arith.constant 0 : index
    %c0_3 = arith.constant 0 : index
    %c0_4 = arith.constant 0 : index
    %2 = vector.load %arg1[%c0_2, %c0_3, %c0_4] : memref<2x8x128xf32, #tpu.memory_space<vmem>>, vector<2x8x128xf32>
    tpu.vector_store %arg1[%c0_2, %c0_3, %c0_4], %1 {strides = array<i32>} : memref<2x8x128xf32, #tpu.memory_space<vmem>>, vector<2x8x128xf32>,
    return
  }
}

module attributes {stable_mosaic.version = 11 : i64} {
  func.func @kernel(%arg0: i32, %arg1: memref<8x16x16xf32, #tpu.memory_space<vmem>>, %arg2: memref<8x16x16xf32, #tpu.memory_space<vmem>>) attributes {dimension_semantics = [#tpu.dimension_semantics<parallel>], iteration_bounds = array<i64: 1>, scalar_prefetch = 0 : i64, scratch_operands = 0 : i64, tpu.core_type = #tpu.core_type<tc>, window_params = [{transform_indices = @transform_0, window_bounds = array<i64: 8, 16, 16>}, {transform_indices = @transform_1, window_bounds = array<i64: 8, 16, 16>}]} {
    %c0 = arith.constant 0 : index
    %c2 = arith.constant 2 : index
    %c0_0 = arith.constant 0 : index
    %0 = vector.load %arg1[%c0, %c2, %c0_0] : memref<8x16x16xf32, #tpu.memory_space<vmem>>, vector<8x1x16xf32>
    %c0_1 = arith.constant 0 : index
    %c1 = arith.constant 1 : index
    %c0_2 = arith.constant 0 : index
    %1 = vector.load %arg1[%c0_1, %c1, %c0_2] : memref<8x16x16xf32, #tpu.memory_space<vmem>>, vector<8x1x16xf32>
    %c0_3 = arith.constant 0 : index
    %c0_4 = arith.constant 0 : index
    %c0_5 = arith.constant 0 : index
    %2 = vector.load %arg1[%c0_3, %c0_4, %c0_5] : memref<8x16x16xf32, #tpu.memory_space<vmem>>, vector<8x16x16xf32>
    %c0_6 = arith.constant 0 : index
    %c14 = arith.constant 14 : index
    %c0_7 = arith.constant 0 : index
    %3 = vector.load %arg1[%c0_6, %c14, %c0_7] : memref<8x16x16xf32, #tpu.memory_space<vmem>>, vector<8x1x16xf32>
    %c0_8 = arith.constant 0 : index
    %c13 = arith.constant 13 : index
    %c0_9 = arith.constant 0 : index
    %4 = vector.load %arg1[%c0_8, %c13, %c0_9] : memref<8x16x16xf32, #tpu.memory_space<vmem>>, vector<8x1x16xf32>
    %5 = tpu.concatenate %0, %1, %2, %3, %4 in 1 : vector<8x1x16xf32>, vector<8x1x16xf32>, vector<8x16x16xf32>, vector<8x1x16xf32>, vector<8x1x16xf32> -> vector<8x20x16xf32>
    %6 = vector.extract_strided_slice %5 {offsets = [0, 0, 0], sizes = [8, 16, 16], strides = [1, 1, 1]} : vector<8x20x16xf32> to vector<8x16x16xf32>
    %cst = arith.constant 0.054488685 : f32
    %7 = vector.broadcast %cst : f32 to vector<8x16x16xf32>
    %8 = arith.mulf %7, %6 : vector<8x16x16xf32>
    %9 = vector.extract_strided_slice %5 {offsets = [0, 1, 0], sizes = [8, 16, 16], strides = [1, 1, 1]} : vector<8x20x16xf32> to vector<8x16x16xf32>
    %cst_10 = arith.constant 0.244201347 : f32
    %10 = vector.broadcast %cst_10 : f32 to vector<8x16x16xf32>
    %11 = arith.mulf %10, %9 : vector<8x16x16xf32>
    %12 = arith.addf %8, %11 : vector<8x16x16xf32>
    %13 = vector.extract_strided_slice %5 {offsets = [0, 2, 0], sizes = [8, 16, 16], strides = [1, 1, 1]} : vector<8x20x16xf32> to vector<8x16x16xf32>
    %cst_11 = arith.constant 0.402619958 : f32
    %14 = vector.broadcast %cst_11 : f32 to vector<8x16x16xf32>
    %15 = arith.mulf %14, %13 : vector<8x16x16xf32>
    %16 = arith.addf %12, %15 : vector<8x16x16xf32>
    %17 = vector.extract_strided_slice %5 {offsets = [0, 3, 0], sizes = [8, 16, 16], strides = [1, 1, 1]} : vector<8x20x16xf32> to vector<8x16x16xf32>
    %cst_12 = arith.constant 0.244201347 : f32
    %18 = vector.broadcast %cst_12 : f32 to vector<8x16x16xf32>
    %19 = arith.mulf %18, %17 : vector<8x16x16xf32>
    %20 = arith.addf %16, %19 : vector<8x16x16xf32>
    %21 = vector.extract_strided_slice %5 {offsets = [0, 4, 0], sizes = [8, 16, 16], strides = [1, 1, 1]} : vector<8x20x16xf32> to vector<8x16x16xf32>
    %cst_13 = arith.constant 0.054488685 : f32
    %22 = vector.broadcast %cst_13 : f32 to vector<8x16x16xf32>
    %23 = arith.mulf %22, %21 : vector<8x16x16xf32>
    %24 = arith.addf %20, %23 : vector<8x16x16xf32>
    %25 = vector.extract_strided_slice %24 {offsets = [0, 0, 2], sizes = [8, 16, 1], strides = [1, 1, 1]} : vector<8x16x16xf32> to vector<8x16x1xf32>
    %26 = vector.extract_strided_slice %24 {offsets = [0, 0, 1], sizes = [8, 16, 1], strides = [1, 1, 1]} : vector<8x16x16xf32> to vector<8x16x1xf32>
    %27 = vector.extract_strided_slice %24 {offsets = [0, 0, 14], sizes = [8, 16, 1], strides = [1, 1, 1]} : vector<8x16x16xf32> to vector<8x16x1xf32>
    %28 = vector.extract_strided_slice %24 {offsets = [0, 0, 13], sizes = [8, 16, 1], strides = [1, 1, 1]} : vector<8x16x16xf32> to vector<8x16x1xf32>
    %cst_14 = arith.constant 0.000000e+00 : f32
    %29 = vector.broadcast %cst_14 : f32 to vector<8x16x108xf32>
    %30 = tpu.concatenate %25, %26, %24, %27, %28, %29 in 2 : vector<8x16x1xf32>, vector<8x16x1xf32>, vector<8x16x16xf32>, vector<8x16x1xf32>, vector<8x16x1xf32>, vector<8x16x108xf32> -> vector<8x16x128xf32>
    %31 = vector.extract_strided_slice %30 {offsets = [0, 0, 0], sizes = [8, 16, 16], strides = [1, 1, 1]} : vector<8x16x128xf32> to vector<8x16x16xf32>
    %cst_15 = arith.constant 0.054488685 : f32
    %32 = vector.broadcast %cst_15 : f32 to vector<8x16x16xf32>
    %33 = arith.mulf %32, %31 : vector<8x16x16xf32>
    %34 = vector.extract_strided_slice %30 {offsets = [0, 0, 1], sizes = [8, 16, 16], strides = [1, 1, 1]} : vector<8x16x128xf32> to vector<8x16x16xf32>
    %cst_16 = arith.constant 0.244201347 : f32
    %35 = vector.broadcast %cst_16 : f32 to vector<8x16x16xf32>
    %36 = arith.mulf %35, %34 : vector<8x16x16xf32>
    %37 = arith.addf %33, %36 : vector<8x16x16xf32>
    %38 = vector.extract_strided_slice %30 {offsets = [0, 0, 2], sizes = [8, 16, 16], strides = [1, 1, 1]} : vector<8x16x128xf32> to vector<8x16x16xf32>
    %cst_17 = arith.constant 0.402619958 : f32
    %39 = vector.broadcast %cst_17 : f32 to vector<8x16x16xf32>
    %40 = arith.mulf %39, %38 : vector<8x16x16xf32>
    %41 = arith.addf %37, %40 : vector<8x16x16xf32>
    %42 = vector.extract_strided_slice %30 {offsets = [0, 0, 3], sizes = [8, 16, 16], strides = [1, 1, 1]} : vector<8x16x128xf32> to vector<8x16x16xf32>
    %cst_18 = arith.constant 0.244201347 : f32
    %43 = vector.broadcast %cst_18 : f32 to vector<8x16x16xf32>
    %44 = arith.mulf %43, %42 : vector<8x16x16xf32>
    %45 = arith.addf %41, %44 : vector<8x16x16xf32>
    %46 = vector.extract_strided_slice %30 {offsets = [0, 0, 4], sizes = [8, 16, 16], strides = [1, 1, 1]} : vector<8x16x128xf32> to vector<8x16x16xf32>
    %cst_19 = arith.constant 0.054488685 : f32
    %47 = vector.broadcast %cst_19 : f32 to vector<8x16x16xf32>
    %48 = arith.mulf %47, %46 : vector<8x16x16xf32>
    %49 = arith.addf %45, %48 : vector<8x16x16xf32>
    %c0_20 = arith.constant 0 : index
    %c0_21 = arith.constant 0 : index
    %c0_22 = arith.constant 0 : index
    %50 = vector.load %arg2[%c0_20, %c0_21, %c0_22] : memref<8x16x16xf32, #tpu.memory_space<vmem>>, vector<8x16x16xf32>
    tpu.vector_store %arg2[%c0_20, %c0_21, %c0_22], %49 {strides = array<i32>} : memref<8x16x16xf32, #tpu.memory_space<vmem>>, vector<8x16x16xf32>,
    return
  }
  func.func @transform_0(%arg0: i32) -> (i32, i32, i32) {
    %c0_i32 = arith.constant 0 : i32
    %c0_i32_0 = arith.constant 0 : i32
    %c0_i32_1 = arith.constant 0 : i32
    return %arg0, %c0_i32, %c0_i32_0 : i32, i32, i32
  }
  func.func @transform_1(%arg0: i32) -> (i32, i32, i32) {
    %c0_i32 = arith.constant 0 : i32
    %c0_i32_0 = arith.constant 0 : i32
    %c0_i32_1 = arith.constant 0 : i32
    return %arg0, %c0_i32, %c0_i32_0 : i32, i32, i32
  }
}

</mosaic_0001>

<bundles_post_ra>
// kernel: tpu_custom_call.1
= control target key start
LH: loop header
LB: loop body
LE: loop exit
PB: predicated region body
PF: predicated region fallthrough
CT: control target
= control target key end

     0   :  { %6 = vsyncpa [#allocation3], 0  ;;  %s130_s0 = inlined_call_operand.hbm [shape: f32[2,8,128], index: 0, kind: input, shape index: {}]   ;;  %s131_s1 = inlined_call_operand.hbm [shape: f32[2,8,128], index: 1, kind: output, shape index: {}]  }
   0x1   :  { %7 = vsyncpa [#allocation4], 0  ;;  %s12_s8 = sshll.u32 %s130_s0, 4  ;;  %s109_s9 = smov [#allocation2]   ;;  %s13_s8 = int_to_ptr.hbm [resolvable:$true] %s12_s8 }
   0x2   :  { %s14_s10 = sshll.u32 %s109_s9, 4  ;;  %s110_s11 = smov 128   ;;  %s15_s10 = int_to_ptr.vmem [resolvable:$true] %s14_s10 }
   0x3   :  { %s111_s12 = smov 8  }
   0x4   :  { %20 = dma.hbm_to_vmem [thread:$0]  %s13_s8, 256, %s15_s10, [#allocation3], %s110_s11, %s110_s11, %s111_s12  }
   0x5   :  { %105 = dma.done.wait [#allocation3], 256  }
   0x6   :  { %106 = vsyncadd [#allocation3], 4294967040  ;;  %v25_v0 = vld [vmem:[#allocation2] sm:$0xff]  ;;  %s112_s13 = smov 125   ;;  %v26_v1 = vld [vmem:[#allocation2 + $0x8] sm:$0xff]  ;;  %s113_s14 = smov [#allocation5]  }
   0x7   :  { %27 = vrot.lane.b32.xlu0 %v25_v0, %s112_s13  ;;  %s37_s15 = sshll.u32 %s113_s14, 4  ;;  %s39_s17 = sshll.u32 %s131_s1, 4  ;;  %s38_s15 = int_to_ptr.vmem [resolvable:$true] %s37_s15  ;;  %s40_s17 = int_to_ptr.hbm [resolvable:$true] %s39_s17 }
   0xf   :  { %29 = vrot.lane.b32.xlu0 %v26_v1, %s112_s13 }
  0x79   :  { %v28_v2 = vpop.permute.xlu0 %27 }
  0x7a   :  { %31 = vst [vmem:[#allocation5] sm:$0xff] %v28_v2 }
  0x81   :  { %v30_v3 = vpop.permute.xlu0 %29 }
  0x82   :  { %32 = vst [vmem:[#allocation5 + $0x8] sm:$0xff] %v30_v3 }
  0x83   :  { %45 = dma.vmem_to_hbm [thread:$0]  %s38_s15, 256, %s40_s17, [#allocation4], %s110_s11, %s110_s11, %s111_s12  }
  0x84   :  { %107 = dma.done.wait [#allocation4], 256  }
  0x85   :  { %108 = vsyncadd [#allocation4], 4294967040 }
  0x86   :  { %50 = vsyncpa [#allocation3], 1 }
  0x87   :  { %51 = vsyncpa [#allocation4], 1 }

// kernel: tpu_custom_call.1
= control target key start
LH: loop header
LB: loop body
LE: loop exit
PB: predicated region body
PF: predicated region fallthrough
CT: control target
= control target key end

     0   :  { %6 = vsyncpa [#allocation3], 0  ;;  %s2297_s0 = inlined_call_operand.hbm [shape: f32[8,16,16], index: 0, kind: input, shape index: {}]   ;;  %s2298_s1 = inlined_call_operand.hbm [shape: f32[8,16,16], index: 1, kind: output, shape index: {}]  }
   0x1   :  { %7 = vsyncpa [#allocation4], 0  ;;  %s12_s8 = sshll.u32 %s2297_s0, 4  ;;  %s1424_s9 = smov [#allocation2]   ;;  %s13_s8 = int_to_ptr.hbm [resolvable:$true] %s12_s8 }
   0x2   :  { %s14_s10 = sshll.u32 %s1424_s9, 4  ;;  %s1425_s11 = smov 128   ;;  %s15_s10 = int_to_ptr.vmem [resolvable:$true] %s14_s10 }
   0x3   :  { %s1426_s12 = smov 8  }
   0x4   :  { %20 = dma.hbm_to_vmem [thread:$0]  %s13_s8, 2048, %s15_s10, [#allocation3], %s1425_s11, %s1425_s11, %s1426_s12  }
   0x5   :  { %1420 = dma.done.wait [#allocation3], 2048  }
   0x6   :  { %1421 = vsyncadd [#allocation3], 4294965248  ;;  %vm113_vm0 = vcmask 1041408   ;;  %vm210_vm1 = vcmask 1040384   ;;  %vm308_vm2 = vcmask 1046528   ;;  %v45_v2 = vld [vmem:[#allocation2 + $0x20] sm:$0xff] }
   0x7   :  { %v27_v0 = vld [vmem:[#allocation2 + $0x22] sm:$0x1]  ;;  %v35_v1 = vld [vmem:[#allocation2 + $0x21] sm:$0x1]  ;;  %vm429_vm3 = vcmask 1045504   ;;  %v1451_v3 = vld [vmem:[#allocation2 + $0x28] sm:$0xff] }
   0x8   :  { %v83_v4 = vrot.slane %v35_v1, 7  ;;  %v120_v5 = vrot.slane %v45_v2, 6  ;;  %vm502_vm4 = vcmask 1044480   ;;  %vm607_vm5 = vcmask 1043456   ;;  %v43_v6 = vld [vmem:[#allocation2 + $0x10] sm:$0xff]  ;;  %v1454_v9 = vld [vmem:[#allocation2 + $0x18] sm:$0xff] }
   0x9   :  { %v121_v7 = vrot.slane %v1451_v3, 6  ;;  %v34_v8 = vld [vmem:[#allocation2 + $0x11] sm:$0x1]  ;;  %v117_v10 = vrot.slane %v43_v6, 6  ;;  %v41_v11 = vld [vmem:[#allocation2] sm:$0xff]  ;;  %v118_v15 = vrot.slane %v1454_v9, 6 }
   0xa   :  { %v213_v12 = vsel %vm210_vm1, %v27_v0, %v83_v4  ;;  %v26_v13 = vld [vmem:[#allocation2 + $0x12] sm:$0x1]  ;;  %v82_v14 = vrot.slane %v34_v8, 7  ;;  %v33_v16 = vld [vmem:[#allocation2 + $0x1] sm:$0x1]  ;;  %v114_v20 = vrot.slane %v41_v11, 6 }
   0xb   :  { %v122_v17 = vsel %vm113_vm0, %v120_v5, %v121_v7  ;;  %v221_v18 = vsel %vm113_vm0, %v213_v12, %v120_v5  ;;  %v81_v19 = vrot.slane %v33_v16, 7  ;;  %v119_v24 = vsel %vm113_vm0, %v117_v10, %v118_v15  ;;  %v25_v45 = vld [vmem:[#allocation2 + $0x2] sm:$0x1]  ;;  %v1494_v50 = vld [vmem:[#allocation2 + $0x8] sm:$0xff]  ;;  %s1427_s0 = smov 126   ;;  %s1428_s13 = smov 2  }
   0xc   :  { %v248_v21 = vmul.f32 0.054488685, %v221_v18  ;;  %v1462_v22 = vmul.f32 0.054488685, %v122_v17  ;;  %v266_v23 = vmul.f32 0.24420135, %v221_v18  ;;  %v212_v28 = vsel %vm210_vm1, %v26_v13, %v82_v14 }
   0xd   :  { %v1467_v25 = vmul.f32 0.24420135, %v122_v17  ;;  %v387_v26 = vmul.f32 0.40261996, %v221_v18  ;;  %v1469_v27 = vmul.f32 0.40261996, %v122_v17  ;;  %v220_v38 = vsel %vm113_vm0, %v212_v28, %v117_v10 }
   0xe   :  { %v319_v29 = vrot.slane %v266_v23, 1  ;;  %v513_v30 = vrot.slane %v266_v23, 3  ;;  %v618_v31 = vrot.slane %v248_v21, 4  ;;  %v619_v32 = vrot.slane %v1462_v22, 4  ;;  %v59_v10 = vld [vmem:[#allocation2 + $0x2e] sm:$0x1] }
   0xf   :  { %v320_v33 = vrot.slane %v1467_v25, 1  ;;  %v440_v34 = vrot.slane %v387_v26, 2  ;;  %v441_v35 = vrot.slane %v1469_v27, 2  ;;  %v514_v36 = vrot.slane %v1467_v25, 3  ;;  %v67_v11 = vld [vmem:[#allocation2 + $0x2d] sm:$0x1] }
  0x10   :  { %v620_v37 = vsel %vm607_vm5, %v618_v31, %v619_v32  ;;  %v1480_v39 = vmul.f32 0.054488685, %v119_v24  ;;  %v1482_v40 = vmul.f32 0.24420135, %v119_v24  ;;  %v246_v44 = vmul.f32 0.054488685, %v220_v38 }
  0x11   :  { %v321_v41 = vsel %vm308_vm2, %v319_v29, %v320_v33  ;;  %v442_v42 = vsel %vm429_vm3, %v440_v34, %v441_v35  ;;  %v515_v43 = vsel %vm502_vm4, %v513_v30, %v514_v36  ;;  %v263_v47 = vmul.f32 0.24420135, %v220_v38  ;;  %v58_v23 = vld [vmem:[#allocation2 + $0x1e] sm:$0x1]  ;;  %v66_v29 = vld [vmem:[#allocation2 + $0x1d] sm:$0x1] }
  0x12   :  { %v369_v46 = vadd.f32 %v321_v41, %v248_v21  ;;  %v315_v48 = vrot.slane %v1482_v40, 1  ;;  %v384_v49 = vmul.f32 0.40261996, %v220_v38  ;;  %v1496_v51 = vmul.f32 0.40261996, %v119_v24  ;;  %s1429_s14 = smov 4  }
  0x13   :  { %v509_v52 = vrot.slane %v1482_v40, 3  ;;  %v613_v53 = vrot.slane %v246_v44, 4  ;;  %v614_v54 = vrot.slane %v1480_v39, 4  ;;  %v314_v56 = vrot.slane %v263_v47, 1  ;;  %v57_v38 = vld [vmem:[#allocation2 + $0xe] sm:$0x1] }
  0x14   :  { %v490_v55 = vadd.f32 %v442_v42, %v369_v46  ;;  %v435_v57 = vrot.slane %v384_v49, 2  ;;  %v508_v58 = vrot.slane %v263_v47, 3  ;;  %vm235_vm6 = vcmask 1042432   ;;  %v37_v46 = vld [vmem:[#allocation2 + $0x41] sm:$0x1]  ;;  %s1430_s15 = smov 6  }
  0x15   :  { %v436_v59 = vrot.slane %v1496_v51, 2  ;;  %v615_v60 = vsel %vm607_vm5, %v613_v53, %v614_v54  ;;  %v115_v61 = vrot.slane %v1494_v50, 6  ;;  %v211_v62 = vsel %vm210_vm1, %v25_v45, %v81_v19  ;;  %v65_v45 = vld [vmem:[#allocation2 + $0xd] sm:$0x1]  ;;  %s1431_s16 = smov 127   ;;  %s1432_s17 = smov 125  }
  0x16   :  { %v563_v63 = vadd.f32 %v515_v43, %v490_v55  ;;  %v316_v0 = vsel %vm308_vm2, %v314_v56, %v315_v48  ;;  %v510_v1 = vsel %vm502_vm4, %v508_v58, %v509_v52  ;;  %v219_v2 = vsel %vm113_vm0, %v211_v62, %v114_v20  ;;  %v49_v62 = vld [vmem:[#allocation2 + $0x40] sm:$0xff]  ;;  %s1433_s18 = smov 124   ;;  %s1434_s19 = smov [#allocation5]  }
  0x17   :  { %v367_v4 = vadd.f32 %v316_v0, %v246_v44  ;;  %v437_v5 = vsel %vm429_vm3, %v435_v57, %v436_v59  ;;  %v116_v6 = vsel %vm113_vm0, %v114_v20, %v115_v61  ;;  %v244_v8 = vmul.f32 0.054488685, %v219_v2  ;;  %s1346_s20 = sshll.u32 %s1434_s19, 4  ;;  %s1348_s23 = sshll.u32 %s2298_s1, 4  ;;  %s1347_s20 = int_to_ptr.vmem [resolvable:$true] %s1346_s20  ;;  %s1349_s23 = int_to_ptr.hbm [resolvable:$true] %s1348_s23 }
  0x18   :  { %v1517_v12 = vadd.f32 %v620_v37, %v563_v63  ;;  %v1519_v13 = vmul.f32 0.054488685, %v116_v6  ;;  %v260_v14 = vmul.f32 0.24420135, %v219_v2  ;;  %v1521_v16 = vmul.f32 0.24420135, %v116_v6 }
  0x19   :  { %v488_v17 = vadd.f32 %v437_v5, %v367_v4  ;;  %v381_v18 = vmul.f32 0.40261996, %v219_v2  ;;  %v1523_v19 = vmul.f32 0.40261996, %v116_v6  ;;  %v608_v21 = vrot.slane %v244_v8, 4 }
  0x1a   :  { %704 = vrot.lane.b32.xlu2 %v1517_v12, %s1427_s0  ;;  %v309_v20 = vrot.slane %v260_v14, 1  ;;  %v310_v24 = vrot.slane %v1521_v16, 1  ;;  %v503_v26 = vrot.slane %v260_v14, 3  ;;  %v504_v28 = vrot.slane %v1521_v16, 3 }
  0x1b   :  { %v561_v30 = vadd.f32 %v510_v1, %v488_v17  ;;  %v430_v31 = vrot.slane %v381_v18, 2  ;;  %v431_v34 = vrot.slane %v1523_v19, 2  ;;  %v609_v37 = vrot.slane %v1519_v13, 4 }
  0x1c   :  { %v311_v41 = vsel %vm308_vm2, %v309_v20, %v310_v24  ;;  %v505_v42 = vsel %vm502_vm4, %v503_v26, %v504_v28  ;;  %v172_v43 = vrot.slane %v59_v10, 6  ;;  %v196_v44 = vrot.slane %v67_v11, 5  ;;  %v1556_v10 = vld [vmem:[#allocation2 + $0x48] sm:$0xff] }
  0x1d   :  { %v1537_v47 = vadd.f32 %v615_v60, %v561_v30  ;;  %v365_v49 = vadd.f32 %v311_v41, %v244_v8  ;;  %v432_v50 = vsel %vm429_vm3, %v430_v31, %v431_v34  ;;  %v610_v53 = vsel %vm607_vm5, %v608_v21, %v609_v37 }
  0x1e   :  { %v229_v55 = vsel %vm113_vm0, %v121_v7, %v172_v43  ;;  %v171_v56 = vrot.slane %v58_v23, 6  ;;  %v195_v57 = vrot.slane %v66_v29, 5  ;;  %v170_v58 = vrot.slane %v57_v38, 6  ;;  %v29_v23 = vld [vmem:[#allocation2 + $0x42] sm:$0x1] }
  0x1f   :  { %700 = vrot.lane.b32.xlu1 %v1537_v47, %s1427_s0  ;;  %v486_v60 = vadd.f32 %v432_v50, %v365_v49  ;;  %v238_v63 = vsel %vm235_vm6, %v229_v55, %v196_v44  ;;  %v194_v0 = vrot.slane %v65_v45, 5  ;;  %v85_v1 = vrot.slane %v37_v46, 7 }
  0x20   :  { %v268_v2 = vmul.f32 0.24420135, %v238_v63  ;;  %v389_v4 = vmul.f32 0.40261996, %v238_v63  ;;  %v577_v5 = vmul.f32 0.054488685, %v238_v63  ;;  %v228_v3 = vsel %vm113_vm0, %v118_v15, %v171_v56 }
  0x21   :  { %v559_v7 = vadd.f32 %v505_v42, %v486_v60  ;;  %v237_v6 = vsel %vm235_vm6, %v228_v3, %v195_v57  ;;  %v227_v8 = vsel %vm113_vm0, %v115_v61, %v170_v58  ;;  %v126_v11 = vrot.slane %v49_v62, 6 }
  0x22   :  { %v322_v14 = vrot.slane %v268_v2, 1  ;;  %v443_v17 = vrot.slane %v389_v4, 2  ;;  %v516_v18 = vrot.slane %v268_v2, 3  ;;  %v621_v21 = vrot.slane %v577_v5, 4 }
  0x23   :  { %v1558_v20 = vadd.f32 %v610_v53, %v559_v7  ;;  %v265_v26 = vmul.f32 0.24420135, %v237_v6  ;;  %v386_v29 = vmul.f32 0.40261996, %v237_v6  ;;  %v576_v9 = vmul.f32 0.054488685, %v237_v6 }
  0x24   :  { %v323_v15 = vsel %vm308_vm2, %v320_v33, %v322_v14  ;;  %v444_v61 = vsel %vm429_vm3, %v441_v35, %v443_v17  ;;  %v517_v30 = vsel %vm502_vm4, %v514_v36, %v516_v18  ;;  %v622_v31 = vsel %vm607_vm5, %v619_v32, %v621_v21  ;;  %v60_v14 = vld [vmem:[#allocation2 + $0x3e] sm:$0x1]  ;;  %v68_v21 = vld [vmem:[#allocation2 + $0x3d] sm:$0x1] }
  0x25   :  { %696 = vrot.lane.b32.xlu0 %v1558_v20, %s1427_s0  ;;  %v370_v38 = vadd.f32 %v323_v15, %v1462_v22  ;;  %v317_v41 = vrot.slane %v265_v26, 1  ;;  %v438_v42 = vrot.slane %v386_v29, 2  ;;  %v511_v33 = vrot.slane %v265_v26, 3 }
  0x26   :  { %v616_v43 = vrot.slane %v576_v9, 4  ;;  %v236_v27 = vsel %vm235_vm6, %v227_v8, %v194_v0  ;;  %v127_v35 = vrot.slane %v1556_v10, 6  ;;  %v215_v25 = vsel %vm210_vm1, %v29_v23, %v85_v1 }
  0x27   :  { %v491_v36 = vadd.f32 %v444_v61, %v370_v38  ;;  %v318_v32 = vsel %vm308_vm2, %v315_v48, %v317_v41  ;;  %v439_v44 = vsel %vm429_vm3, %v436_v59, %v438_v42  ;;  %v512_v22 = vsel %vm502_vm4, %v509_v52, %v511_v33  ;;  %v36_v38 = vld [vmem:[#allocation2 + $0x31] sm:$0x1]  ;;  %v52_v42 = vld [vmem:[#allocation2 + $0x58] sm:$0xff] }
  0x28   :  { %v368_v45 = vadd.f32 %v318_v32, %v1480_v39  ;;  %v617_v46 = vsel %vm607_vm5, %v614_v54, %v616_v43  ;;  %v262_v49 = vmul.f32 0.24420135, %v236_v27  ;;  %v383_v50 = vmul.f32 0.40261996, %v236_v27  ;;  %v1638_v41 = vld [vmem:[#allocation2 + $0x50] sm:$0xff] }
  0x29   :  { %v564_v53 = vadd.f32 %v517_v30, %v491_v36  ;;  %v575_v55 = vmul.f32 0.054488685, %v236_v27  ;;  %v128_v48 = vsel %vm113_vm0, %v126_v11, %v127_v35  ;;  %v223_v51 = vsel %vm113_vm0, %v215_v25, %v126_v11 }
  0x2a   :  { %v489_v59 = vadd.f32 %v439_v44, %v368_v45  ;;  %v312_v40 = vrot.slane %v262_v49, 1  ;;  %v433_v56 = vrot.slane %v383_v50, 2  ;;  %v506_v52 = vrot.slane %v262_v49, 3 }
  0x2b   :  { %v1595_v57 = vadd.f32 %v622_v31, %v564_v53  ;;  %v611_v58 = vrot.slane %v575_v55, 4  ;;  %v252_v39 = vmul.f32 0.054488685, %v223_v51  ;;  %v1597_v62 = vmul.f32 0.054488685, %v128_v48 }
  0x2c   :  { %v562_v54 = vadd.f32 %v512_v22, %v489_v59  ;;  %v313_v60 = vsel %vm308_vm2, %v310_v24, %v312_v40  ;;  %v434_v63 = vsel %vm429_vm3, %v431_v34, %v433_v56  ;;  %v507_v0 = vsel %vm502_vm4, %v504_v28, %v506_v52  ;;  %v48_v24 = vld [vmem:[#allocation2 + $0x38] sm:$0xff]  ;;  %v47_v28 = vld [vmem:[#allocation2 + $0x30] sm:$0xff] }
  0x2d   :  { %706 = vrot.lane.b32.xlu2 %v1595_v57, %s1427_s0  ;;  %v366_v1 = vadd.f32 %v313_v60, %v1519_v13  ;;  %v612_v2 = vsel %vm607_vm5, %v609_v37, %v611_v58  ;;  %v272_v4 = vmul.f32 0.24420135, %v223_v51  ;;  %v1614_v5 = vmul.f32 0.24420135, %v128_v48  ;;  %v62_v40 = vld [vmem:[#allocation2 + $0x5e] sm:$0x1] }
  0x2e   :  { %v1616_v19 = vadd.f32 %v617_v46, %v562_v54  ;;  %v393_v34 = vmul.f32 0.40261996, %v223_v51  ;;  %v1618_v3 = vmul.f32 0.40261996, %v128_v48  ;;  %v628_v16 = vrot.slane %v252_v39, 4 }
  0x2f   :  { %v487_v7 = vadd.f32 %v434_v63, %v366_v1  ;;  %v329_v6 = vrot.slane %v272_v4, 1  ;;  %v330_v8 = vrot.slane %v1614_v5, 1  ;;  %v523_v11 = vrot.slane %v272_v4, 3  ;;  %v28_v46 = vld [vmem:[#allocation2 + $0x32] sm:$0x1] }
  0x30   :  { %702 = vrot.lane.b32.xlu1 %v1616_v19, %s1427_s0  ;;  %v450_v13 = vrot.slane %v393_v34, 2  ;;  %v451_v37 = vrot.slane %v1618_v3, 2  ;;  %v524_v17 = vrot.slane %v1614_v5, 3  ;;  %v629_v18 = vrot.slane %v1597_v62, 4  ;;  %v70_v34 = vld [vmem:[#allocation2 + $0x5d] sm:$0x1] }
  0x31   :  { %v560_v23 = vadd.f32 %v507_v0, %v487_v7  ;;  %v331_v26 = vsel %vm308_vm2, %v329_v6, %v330_v8  ;;  %v123_v29 = vrot.slane %v47_v28, 6  ;;  %v124_v9 = vrot.slane %v48_v24, 6 }
  0x32   :  { %v373_v15 = vadd.f32 %v331_v26, %v252_v39  ;;  %v452_v61 = vsel %vm429_vm3, %v450_v13, %v451_v37  ;;  %v525_v30 = vsel %vm502_vm4, %v523_v11, %v524_v17  ;;  %v630_v31 = vsel %vm607_vm5, %v628_v16, %v629_v18 }
  0x33   :  { %v1640_v33 = vadd.f32 %v612_v2, %v560_v23  ;;  %v125_v43 = vsel %vm113_vm0, %v123_v29, %v124_v9  ;;  %v173_v27 = vrot.slane %v60_v14, 6  ;;  %v197_v25 = vrot.slane %v68_v21, 5 }
  0x34   :  { %v494_v36 = vadd.f32 %v452_v61, %v373_v15  ;;  %v251_v32 = vmul.f32 0.054488685, %v125_v43  ;;  %v270_v44 = vmul.f32 0.24420135, %v125_v43  ;;  %v391_v22 = vmul.f32 0.40261996, %v125_v43 }
  0x35   :  { %698 = vrot.lane.b32.xlu0 %v1640_v33, %s1427_s0  ;;  %v230_v45 = vsel %vm113_vm0, %v124_v9, %v173_v27  ;;  %v84_v49 = vrot.slane %v36_v38, 7  ;;  %v129_v50 = vrot.slane %v1638_v41, 6  ;;  %v130_v53 = vrot.slane %v52_v42, 6 }
  0x36   :  { %v567_v55 = vadd.f32 %v525_v30, %v494_v36  ;;  %v239_v48 = vsel %vm235_vm6, %v230_v45, %v197_v25  ;;  %v325_v51 = vrot.slane %v270_v44, 1  ;;  %v446_v59 = vrot.slane %v391_v22, 2  ;;  %v38_v22 = vld [vmem:[#allocation2 + $0x51] sm:$0x1]  ;;  %v61_v45 = vld [vmem:[#allocation2 + $0x4e] sm:$0x1] }
  0x37   :  { %v271_v56 = vmul.f32 0.24420135, %v239_v48  ;;  %v392_v52 = vmul.f32 0.40261996, %v239_v48  ;;  %v519_v58 = vrot.slane %v270_v44, 3  ;;  %v624_v39 = vrot.slane %v251_v32, 4 }
  0x38   :  { %v1648_v54 = vadd.f32 %v630_v31, %v567_v55  ;;  %v578_v60 = vmul.f32 0.054488685, %v239_v48  ;;  %v214_v63 = vsel %vm210_vm1, %v28_v46, %v84_v49  ;;  %v131_v0 = vsel %vm113_vm0, %v129_v50, %v130_v53 }
  0x39   :  { %v327_v1 = vrot.slane %v271_v56, 1  ;;  %v448_v2 = vrot.slane %v392_v52, 2  ;;  %v521_v4 = vrot.slane %v271_v56, 3  ;;  %v222_v24 = vsel %vm113_vm0, %v214_v63, %v123_v29  ;;  %v30_v63 = vld [vmem:[#allocation2 + $0x52] sm:$0x1] }
  0x3a   :  { %712 = vrot.lane.b32.xlu2 %v1648_v54, %s1427_s0  ;;  %v626_v16 = vrot.slane %v578_v60, 4  ;;  %v250_v28 = vmul.f32 0.054488685, %v222_v24  ;;  %v269_v7 = vmul.f32 0.24420135, %v222_v24  ;;  %v175_v6 = vrot.slane %v62_v40, 6 }
  0x3b   :  { %v328_v11 = vsel %vm308_vm2, %v325_v51, %v327_v1  ;;  %v449_v14 = vsel %vm429_vm3, %v446_v59, %v448_v2  ;;  %v522_v13 = vsel %vm502_vm4, %v519_v58, %v521_v4  ;;  %v390_v21 = vmul.f32 0.40261996, %v222_v24  ;;  %v69_v24 = vld [vmem:[#allocation2 + $0x4d] sm:$0x1] }
  0x3c   :  { %v372_v23 = vadd.f32 %v328_v11, %v251_v32  ;;  %v627_v26 = vsel %vm607_vm5, %v624_v39, %v626_v16  ;;  %v324_v9 = vrot.slane %v269_v7, 1  ;;  %v518_v29 = vrot.slane %v269_v7, 3  ;;  %v40_v7 = vld [vmem:[#allocation2 + $0x71] sm:$0x1] }
  0x3d   :  { %v445_v15 = vrot.slane %v390_v21, 2  ;;  %v623_v61 = vrot.slane %v250_v28, 4  ;;  %v199_v30 = vrot.slane %v70_v34, 5  ;;  %v232_v31 = vsel %vm113_vm0, %v130_v53, %v175_v6  ;;  %v55_v6 = vld [vmem:[#allocation2 + $0x70] sm:$0xff] }
  0x3e   :  { %v493_v38 = vadd.f32 %v449_v14, %v372_v23  ;;  %v326_v42 = vsel %vm308_vm2, %v324_v9, %v325_v51  ;;  %v520_v43 = vsel %vm502_vm4, %v518_v29, %v519_v58  ;;  %v1664_v27 = vmul.f32 0.054488685, %v131_v0 }
  0x3f   :  { %v371_v25 = vadd.f32 %v326_v42, %v250_v28  ;;  %v447_v36 = vsel %vm429_vm3, %v445_v15, %v446_v59  ;;  %v625_v32 = vsel %vm607_vm5, %v623_v61, %v624_v39  ;;  %v241_v44 = vsel %vm235_vm6, %v232_v31, %v199_v30 }
  0x40   :  { %v566_v46 = vadd.f32 %v522_v13, %v493_v38  ;;  %v276_v49 = vmul.f32 0.24420135, %v131_v0  ;;  %v277_v55 = vmul.f32 0.24420135, %v241_v44  ;;  %v397_v53 = vmul.f32 0.40261996, %v131_v0 }
  0x41   :  { %v492_v48 = vadd.f32 %v447_v36, %v371_v25  ;;  %v398_v40 = vmul.f32 0.40261996, %v241_v44  ;;  %v580_v51 = vmul.f32 0.054488685, %v241_v44  ;;  %v634_v56 = vrot.slane %v1664_v27, 4 }
  0x42   :  { %v1670_v52 = vadd.f32 %v627_v26, %v566_v46  ;;  %v335_v58 = vrot.slane %v276_v49, 1  ;;  %v337_v60 = vrot.slane %v277_v55, 1  ;;  %v456_v59 = vrot.slane %v397_v53, 2  ;;  %v1693_v53 = vld [vmem:[#allocation2 + $0x78] sm:$0xff] }
  0x43   :  { %v565_v39 = vadd.f32 %v520_v43, %v492_v48  ;;  %v458_v1 = vrot.slane %v398_v40, 2  ;;  %v529_v2 = vrot.slane %v276_v49, 3  ;;  %v531_v4 = vrot.slane %v277_v55, 3  ;;  %v32_v55 = vld [vmem:[#allocation2 + $0x72] sm:$0x1] }
  0x44   :  { %710 = vrot.lane.b32.xlu1 %v1670_v52, %s1427_s0  ;;  %v338_v0 = vsel %vm308_vm2, %v335_v58, %v337_v60  ;;  %v636_v34 = vrot.slane %v580_v51, 4  ;;  %v86_v16 = vrot.slane %v38_v22, 7  ;;  %v174_v28 = vrot.slane %v61_v45, 6 }
  0x45   :  { %v1675_v11 = vadd.f32 %v625_v32, %v565_v39  ;;  %v376_v14 = vadd.f32 %v338_v0, %v1664_v27  ;;  %v459_v13 = vsel %vm429_vm3, %v456_v59, %v458_v1  ;;  %v532_v21 = vsel %vm502_vm4, %v529_v2, %v531_v4  ;;  %v54_v39 = vld [vmem:[#allocation2 + $0x68] sm:$0xff] }
  0x46   :  { %v637_v23 = vsel %vm607_vm5, %v634_v56, %v636_v34  ;;  %v216_v26 = vsel %vm210_vm1, %v30_v63, %v86_v16  ;;  %v198_v9 = vrot.slane %v69_v24, 5  ;;  %v231_v29 = vsel %vm113_vm0, %v127_v35, %v174_v28  ;;  %v1699_v63 = vld [vmem:[#allocation2 + $0x60] sm:$0xff] }
  0x47   :  { %708 = vrot.lane.b32.xlu0 %v1675_v11, %s1427_s0  ;;  %v497_v15 = vadd.f32 %v459_v13, %v376_v14  ;;  %v224_v61 = vsel %vm113_vm0, %v216_v26, %v129_v50  ;;  %v88_v30 = vrot.slane %v40_v7, 7  ;;  %v135_v31 = vrot.slane %v55_v6, 6  ;;  %v63_v7 = vld [vmem:[#allocation2 + $0x6e] sm:$0x1] }
  0x48   :  { %v254_v38 = vmul.f32 0.054488685, %v224_v61  ;;  %v275_v42 = vmul.f32 0.24420135, %v224_v61  ;;  %v396_v43 = vmul.f32 0.40261996, %v224_v61  ;;  %v240_v27 = vsel %vm235_vm6, %v231_v29, %v198_v9 }
  0x49   :  { %v570_v25 = vadd.f32 %v532_v21, %v497_v15  ;;  %v274_v36 = vmul.f32 0.24420135, %v240_v27  ;;  %v395_v10 = vmul.f32 0.40261996, %v240_v27  ;;  %v579_v32 = vmul.f32 0.054488685, %v240_v27 }
  0x4a   :  { %v334_v35 = vrot.slane %v275_v42, 1  ;;  %v455_v44 = vrot.slane %v396_v43, 2  ;;  %v528_v22 = vrot.slane %v275_v42, 3  ;;  %v633_v45 = vrot.slane %v254_v38, 4 }
  0x4b   :  { %v1691_v46 = vadd.f32 %v637_v23, %v570_v25  ;;  %v332_v41 = vrot.slane %v274_v36, 1  ;;  %v453_v49 = vrot.slane %v395_v10, 2  ;;  %v526_v50 = vrot.slane %v274_v36, 3 }
  0x4c   :  { %v336_v48 = vsel %vm308_vm2, %v334_v35, %v335_v58  ;;  %v457_v40 = vsel %vm429_vm3, %v455_v44, %v456_v59  ;;  %v530_v51 = vsel %vm502_vm4, %v528_v22, %v529_v2  ;;  %v635_v60 = vsel %vm607_vm5, %v633_v45, %v634_v56 }
  0x4d   :  { %718 = vrot.lane.b32.xlu2 %v1691_v46, %s1427_s0  ;;  %v375_v1 = vadd.f32 %v336_v48, %v254_v38  ;;  %v333_v4 = vsel %vm308_vm2, %v330_v8, %v332_v41  ;;  %v454_v58 = vsel %vm429_vm3, %v451_v37, %v453_v49  ;;  %v527_v59 = vsel %vm502_vm4, %v524_v17, %v526_v50 }
  0x4e   :  { %v374_v56 = vadd.f32 %v333_v4, %v1597_v62  ;;  %v631_v2 = vrot.slane %v579_v32, 4  ;;  %v136_v24 = vrot.slane %v1693_v53, 6  ;;  %v218_v0 = vsel %vm210_vm1, %v32_v55, %v88_v30  ;;  %v71_v30 = vld [vmem:[#allocation2 + $0x6d] sm:$0x1]  ;;  %v39_v32 = vld [vmem:[#allocation2 + $0x61] sm:$0x1] }
  0x4f   :  { %v496_v34 = vadd.f32 %v457_v40, %v375_v1  ;;  %v226_v16 = vsel %vm113_vm0, %v218_v0, %v135_v31  ;;  %v132_v8 = vrot.slane %v1699_v63, 6  ;;  %v133_v28 = vrot.slane %v54_v39, 6  ;;  %v31_v55 = vld [vmem:[#allocation2 + $0x62] sm:$0x1]  ;;  %v64_v63 = vld [vmem:[#allocation2 + $0x7e] sm:$0x1] }
  0x50   :  { %v495_v3 = vadd.f32 %v454_v58, %v374_v56  ;;  %v632_v5 = vsel %vm607_vm5, %v629_v18, %v631_v2  ;;  %v137_v37 = vsel %vm113_vm0, %v135_v31, %v136_v24  ;;  %v258_v17 = vmul.f32 0.054488685, %v226_v16 }
  0x51   :  { %v569_v6 = vadd.f32 %v530_v51, %v496_v34  ;;  %v1723_v14 = vmul.f32 0.054488685, %v137_v37  ;;  %v281_v13 = vmul.f32 0.24420135, %v226_v16  ;;  %v1725_v21 = vmul.f32 0.24420135, %v137_v37 }
  0x52   :  { %v568_v23 = vadd.f32 %v527_v59, %v495_v3  ;;  %v402_v26 = vmul.f32 0.40261996, %v226_v16  ;;  %v1727_v9 = vmul.f32 0.40261996, %v137_v37  ;;  %v643_v29 = vrot.slane %v258_v17, 4 }
  0x53   :  { %v1729_v62 = vadd.f32 %v635_v60, %v569_v6  ;;  %v344_v18 = vrot.slane %v281_v13, 1  ;;  %v345_v15 = vrot.slane %v1725_v21, 1  ;;  %v538_v61 = vrot.slane %v281_v13, 3 }
  0x54   :  { %v1732_v31 = vadd.f32 %v632_v5, %v568_v23  ;;  %v465_v38 = vrot.slane %v402_v26, 2  ;;  %v466_v42 = vrot.slane %v1727_v9, 2  ;;  %v539_v43 = vrot.slane %v1725_v21, 3 }
  0x55   :  { %716 = vrot.lane.b32.xlu1 %v1729_v62, %s1427_s0  ;;  %v346_v27 = vsel %vm308_vm2, %v344_v18, %v345_v15  ;;  %v644_v25 = vrot.slane %v1723_v14, 4  ;;  %v134_v36 = vsel %vm113_vm0, %v132_v8, %v133_v28  ;;  %v176_v10 = vrot.slane %v63_v7, 6 }
  0x56   :  { %714 = vrot.lane.b32.xlu0 %v1732_v31, %s1427_s0  ;;  %v379_v35 = vadd.f32 %v346_v27, %v258_v17  ;;  %v467_v44 = vsel %vm429_vm3, %v465_v38, %v466_v42  ;;  %v200_v22 = vrot.slane %v71_v30, 5  ;;  %v540_v45 = vsel %vm502_vm4, %v538_v61, %v539_v43  ;;  %v72_v17 = vld [vmem:[#allocation2 + $0x7d] sm:$0x1] }
  0x57   :  { %v233_v41 = vsel %vm113_vm0, %v133_v28, %v176_v10  ;;  %v257_v49 = vmul.f32 0.054488685, %v134_v36  ;;  %v279_v50 = vmul.f32 0.24420135, %v134_v36  ;;  %v400_v51 = vmul.f32 0.40261996, %v134_v36 }
  0x58   :  { %v500_v48 = vadd.f32 %v467_v44, %v379_v35  ;;  %v242_v40 = vsel %vm235_vm6, %v233_v41, %v200_v22  ;;  %v87_v60 = vrot.slane %v39_v32, 7  ;;  %v645_v39 = vsel %vm607_vm5, %v643_v29, %v644_v25 }
  0x59   :  { %v280_v1 = vmul.f32 0.24420135, %v242_v40  ;;  %v340_v4 = vrot.slane %v279_v50, 1  ;;  %v401_v58 = vmul.f32 0.40261996, %v242_v40  ;;  %v461_v56 = vrot.slane %v400_v51, 2 }
  0x5a   :  { %v573_v59 = vadd.f32 %v540_v45, %v500_v48  ;;  %v534_v2 = vrot.slane %v279_v50, 3  ;;  %v581_v0 = vmul.f32 0.054488685, %v242_v40  ;;  %v217_v3 = vsel %vm210_vm1, %v31_v55, %v87_v60 }
  0x5b   :  { %v342_v34 = vrot.slane %v280_v1, 1  ;;  %v463_v16 = vrot.slane %v401_v58, 2  ;;  %v536_v28 = vrot.slane %v280_v1, 3  ;;  %v225_v37 = vsel %vm113_vm0, %v217_v3, %v132_v8 }
  0x5c   :  { %v1757_v5 = vadd.f32 %v645_v39, %v573_v59  ;;  %v177_v7 = vrot.slane %v64_v63, 6  ;;  %v639_v23 = vrot.slane %v257_v49, 4  ;;  %v641_v26 = vrot.slane %v581_v0, 4 }
  0x5d   :  { %v343_v6 = vsel %vm308_vm2, %v340_v4, %v342_v34  ;;  %v464_v13 = vsel %vm429_vm3, %v461_v56, %v463_v16  ;;  %v278_v18 = vmul.f32 0.24420135, %v225_v37  ;;  %v399_v61 = vmul.f32 0.40261996, %v225_v37 }
  0x5e   :  { %724 = vrot.lane.b32.xlu2 %v1757_v5, %s1427_s0  ;;  %v378_v29 = vadd.f32 %v343_v6, %v257_v49  ;;  %v537_v30 = vsel %vm502_vm4, %v534_v2, %v536_v28  ;;  %v256_v38 = vmul.f32 0.054488685, %v225_v37  ;;  %v201_v27 = vrot.slane %v72_v17, 5 }
  0x5f   :  { %v234_v8 = vsel %vm113_vm0, %v136_v24, %v177_v7  ;;  %v339_v10 = vrot.slane %v278_v18, 1  ;;  %v460_v32 = vrot.slane %v399_v61, 2  ;;  %v533_v35 = vrot.slane %v278_v18, 3 }
  0x60   :  { %v499_v36 = vadd.f32 %v464_v13, %v378_v29  ;;  %v642_v44 = vsel %vm607_vm5, %v639_v23, %v641_v26  ;;  %v243_v22 = vsel %vm235_vm6, %v234_v8, %v201_v27  ;;  %v638_v50 = vrot.slane %v256_v38, 4 }
  0x61   :  { %v341_v41 = vsel %vm308_vm2, %v339_v10, %v340_v4  ;;  %v462_v49 = vsel %vm429_vm3, %v460_v32, %v461_v56  ;;  %v283_v48 = vmul.f32 0.24420135, %v243_v22  ;;  %v404_v40 = vmul.f32 0.40261996, %v243_v22 }
  0x62   :  { %v572_v45 = vadd.f32 %v537_v30, %v499_v36  ;;  %v377_v55 = vadd.f32 %v341_v41, %v256_v38  ;;  %v535_v24 = vsel %vm502_vm4, %v533_v35, %v534_v2  ;;  %v582_v51 = vmul.f32 0.054488685, %v243_v22 }
  0x63   :  { %v347_v63 = vrot.slane %v283_v48, 1  ;;  %v468_v39 = vrot.slane %v404_v40, 2  ;;  %v541_v1 = vrot.slane %v283_v48, 3  ;;  %v640_v4 = vsel %vm607_vm5, %v638_v50, %v639_v23 }
  0x64   :  { %v1772_v53 = vadd.f32 %v642_v44, %v572_v45  ;;  %v498_v60 = vadd.f32 %v462_v49, %v377_v55  ;;  %v646_v0 = vrot.slane %v582_v51, 4  ;;  %vm905_vm7 = vcmask 15360  }
  0x65   :  { %v348_v59 = vsel %vm308_vm2, %v345_v15, %v347_v63  ;;  %v469_v56 = vsel %vm429_vm3, %v466_v42, %v468_v39  ;;  %v542_v16 = vsel %vm502_vm4, %v539_v43, %v541_v1  ;;  %vm888_vm8 = vcmask 7168  }
  0x66   :  { %722 = vrot.lane.b32.xlu1 %v1772_v53, %s1427_s0  ;;  %746 = vrot.lane.b32.xlu2 %v1640_v33, %s1428_s13  ;;  %v571_v58 = vadd.f32 %v535_v24, %v498_v60  ;;  %v380_v2 = vadd.f32 %v348_v59, %v1723_v14  ;;  %v647_v9 = vsel %vm607_vm5, %v644_v25, %v646_v0  ;;  %vm922_vm9 = vcmask 146432  }
  0x67   :  { %vm939_vm10 = vcmask 154624   ;;  %vm956_vm11 = vcmask 162816   ;;  %vm1325_vm12 = vcmask 130048  }
  0x68   :  { %v1787_v34 = vadd.f32 %v640_v4, %v571_v58  ;;  %v501_v28 = vadd.f32 %v469_v56, %v380_v2 }
  0x6a   :  { %720 = vrot.lane.b32.xlu0 %v1787_v34, %s1427_s0  ;;  %v574_v3 = vadd.f32 %v542_v16, %v501_v28 }
  0x6c   :  { %v1801_v15 = vadd.f32 %v647_v9, %v574_v3 }
  0x6e   :  { %744 = vrot.lane.b32.xlu1 %v1558_v20, %s1428_s13  ;;  %752 = vrot.lane.b32.xlu2 %v1517_v12, %s1428_s13 }
  0x72   :  { %726 = vrot.lane.b32.xlu0 %v1801_v15, %s1427_s0 }
  0x74   :  { %v705_v14 = vpop.permute.xlu2 %704 }
  0x75   :  { %v893_v18 = vsel %vm888_vm8, %v705_v14, %v1517_v12 }
  0x76   :  { %750 = vrot.lane.b32.xlu1 %v1616_v19, %s1428_s13  ;;  %758 = vrot.lane.b32.xlu2 %v1670_v52, %s1428_s13 }
  0x7a   :  { %748 = vrot.lane.b32.xlu0 %v1537_v47, %s1428_s13 }
  0x7e   :  { %756 = vrot.lane.b32.xlu1 %v1675_v11, %s1428_s13  ;;  %764 = vrot.lane.b32.xlu2 %v1729_v62, %s1428_s13 }
  0x82   :  { %754 = vrot.lane.b32.xlu0 %v1595_v57, %s1428_s13 }
  0x86   :  { %762 = vrot.lane.b32.xlu1 %v1732_v31, %s1428_s13  ;;  %770 = vrot.lane.b32.xlu2 %v1772_v53, %s1428_s13 }
  0x87   :  { %v1833_v21 = vpop.permute.xlu2 %706 }
  0x8a   :  { %760 = vrot.lane.b32.xlu0 %v1648_v54, %s1428_s13 }
  0x8e   :  { %768 = vrot.lane.b32.xlu1 %v1787_v34, %s1428_s13  ;;  %792 = vrot.lane.b32.xlu2 %v1558_v20, %s1429_s14 }
  0x91   :  { %v1857_v25 = vpop.permute.xlu1 %700 }
  0x92   :  { %766 = vrot.lane.b32.xlu0 %v1691_v46, %s1428_s13 }
  0x94   :  { %v1843_v42 = vpop.permute.xlu2 %712 }
  0x96   :  { %774 = vrot.lane.b32.xlu1 %v1801_v15, %s1428_s13  ;;  %798 = vrot.lane.b32.xlu2 %v1616_v19, %s1429_s14 }
  0x97   :  { %v697_v37 = vpop.permute.xlu0 %696 }
  0x9a   :  { %772 = vrot.lane.b32.xlu0 %v1757_v5, %s1428_s13 }
  0x9e   :  { %796 = vrot.lane.b32.xlu1 %v1537_v47, %s1429_s14  ;;  %804 = vrot.lane.b32.xlu2 %v1675_v11, %s1429_s14 }
  0xa2   :  { %794 = vrot.lane.b32.xlu0 %v1640_v33, %s1429_s14  ;;  %v703_v7 = vpop.permute.xlu1 %702 }
  0xa6   :  { %802 = vrot.lane.b32.xlu1 %v1595_v57, %s1429_s14  ;;  %810 = vrot.lane.b32.xlu2 %v1732_v31, %s1429_s14 }
  0xa7   :  { %v1855_v43 = vpop.permute.xlu2 %718  ;;  %v699_v6 = vpop.permute.xlu0 %698 }
  0xa8   :  { %v890_v13 = vsel %vm888_vm8, %v699_v6, %v1640_v33 }
  0xaa   :  { %800 = vrot.lane.b32.xlu0 %v1517_v12, %s1429_s14 }
  0xae   :  { %808 = vrot.lane.b32.xlu1 %v1648_v54, %s1429_s14  ;;  %816 = vrot.lane.b32.xlu2 %v1787_v34, %s1429_s14 }
  0xb2   :  { %806 = vrot.lane.b32.xlu0 %v1670_v52, %s1429_s14 }
  0xb6   :  { %814 = vrot.lane.b32.xlu1 %v1691_v46, %s1429_s14  ;;  %822 = vrot.lane.b32.xlu2 %v1801_v15, %s1429_s14  ;;  %v711_v29 = vpop.permute.xlu1 %710 }
  0xb7   :  { %v896_v27 = vsel %vm888_vm8, %v711_v29, %v1670_v52 }
  0xb8   :  { %v1865_v17 = vpop.permute.xlu2 %724 }
  0xb9   :  { %v709_v30 = vpop.permute.xlu0 %708 }
  0xba   :  { %812 = vrot.lane.b32.xlu0 %v1729_v62, %s1429_s14  ;;  %v895_v63 = vsel %vm888_vm8, %v709_v30, %v1675_v11 }
  0xbe   :  { %820 = vrot.lane.b32.xlu1 %v1757_v5, %s1429_s14  ;;  %844 = vrot.lane.b32.xlu2 %v1537_v47, %s1430_s15 }
  0xc0   :  { %v747_v23 = vpop.permute.xlu2 %746 }
  0xc1   :  { %v1876_v26 = vsel %vm905_vm7, %v890_v13, %v747_v23 }
  0xc2   :  { %818 = vrot.lane.b32.xlu0 %v1772_v53, %s1429_s14 }
  0xc6   :  { %842 = vrot.lane.b32.xlu1 %v1640_v33, %s1430_s15  ;;  %850 = vrot.lane.b32.xlu2 %v1595_v57, %s1430_s15 }
  0xc7   :  { %v717_v33 = vpop.permute.xlu1 %716 }
  0xc8   :  { %v753_v61 = vpop.permute.xlu2 %752  ;;  %v715_v10 = vpop.permute.xlu0 %714  ;;  %v899_v32 = vsel %vm888_vm8, %v717_v33, %v1729_v62 }
  0xc9   :  { %v1887_v38 = vsel %vm905_vm7, %v893_v18, %v753_v61  ;;  %v898_v58 = vsel %vm888_vm8, %v715_v10, %v1732_v31 }
  0xca   :  { %840 = vrot.lane.b32.xlu0 %v1558_v20, %s1430_s15 }
  0xce   :  { %848 = vrot.lane.b32.xlu1 %v1517_v12, %s1430_s15  ;;  %856 = vrot.lane.b32.xlu2 %v1648_v54, %s1430_s15 }
  0xd0   :  { %v759_v8 = vpop.permute.xlu2 %758 }
  0xd1   :  { %v1898_v36 = vsel %vm905_vm7, %v896_v27, %v759_v8  ;;  %v891_v27 = vsel %vm888_vm8, %v1857_v25, %v1537_v47  ;;  %v894_v47 = vsel %vm888_vm8, %v1833_v21, %v1595_v57  ;;  %v897_v57 = vsel %vm888_vm8, %v1843_v42, %v1648_v54 }
  0xd2   :  { %846 = vrot.lane.b32.xlu0 %v1616_v19, %s1430_s15  ;;  %v900_v54 = vsel %vm888_vm8, %v1855_v43, %v1691_v46 }
  0xd6   :  { %854 = vrot.lane.b32.xlu1 %v1670_v52, %s1430_s15  ;;  %862 = vrot.lane.b32.xlu2 %v1691_v46, %s1430_s15  ;;  %v889_v52 = vsel %vm888_vm8, %v697_v37, %v1558_v20  ;;  %v903_v46 = vsel %vm888_vm8, %v1865_v17, %v1757_v5 }
  0xd8   :  { %v723_v12 = vpop.permute.xlu1 %722  ;;  %v765_v35 = vpop.permute.xlu2 %764 }
  0xd9   :  { %v1909_v44 = vsel %vm905_vm7, %v899_v32, %v765_v35  ;;  %v902_v45 = vsel %vm888_vm8, %v723_v12, %v1772_v53 }
  0xda   :  { %852 = vrot.lane.b32.xlu0 %v1675_v11, %s1430_s15 }
  0xdc   :  { %v721_v22 = vpop.permute.xlu0 %720 }
  0xdd   :  { %v901_v16 = vsel %vm888_vm8, %v721_v22, %v1787_v34 }
  0xde   :  { %860 = vrot.lane.b32.xlu1 %v1729_v62, %s1430_s15  ;;  %868 = vrot.lane.b32.xlu2 %v1757_v5, %s1430_s15  ;;  %v892_v62 = vsel %vm888_vm8, %v703_v7, %v1616_v19 }
  0xe0   :  { %v745_v41 = vpop.permute.xlu1 %744  ;;  %v771_v49 = vpop.permute.xlu2 %770 }
  0xe1   :  { %v906_v50 = vsel %vm905_vm7, %v889_v52, %v745_v41  ;;  %v1923_v55 = vsel %vm905_vm7, %v902_v45, %v771_v49 }
  0xe2   :  { %858 = vrot.lane.b32.xlu0 %v1732_v31, %s1430_s15 }
  0xe4   :  { %v727_v48 = vpop.permute.xlu0 %726 }
  0xe5   :  { %v904_v31 = vsel %vm888_vm8, %v727_v48, %v1801_v15 }
  0xe6   :  { %866 = vrot.lane.b32.xlu1 %v1772_v53, %s1430_s15 }
  0xe8   :  { %v751_v40 = vpop.permute.xlu1 %750  ;;  %v793_v20 = vpop.permute.xlu2 %792 }
  0xe9   :  { %v909_v24 = vsel %vm905_vm7, %v892_v62, %v751_v40  ;;  %v1933_v51 = vsel %vm922_vm9, %v906_v50, %v793_v20 }
  0xea   :  { %864 = vrot.lane.b32.xlu0 %v1787_v34, %s1430_s15 }
  0xec   :  { %v749_v60 = vpop.permute.xlu0 %748 }
  0xf0   :  { %v757_v39 = vpop.permute.xlu1 %756  ;;  %v799_v53 = vpop.permute.xlu2 %798 }
  0xf1   :  { %v912_v1 = vsel %vm905_vm7, %v895_v63, %v757_v39  ;;  %v1941_v19 = vsel %vm922_vm9, %v909_v24, %v799_v53 }
  0xf2   :  { %870 = vrot.lane.b32.xlu0 %v1801_v15, %s1430_s15  ;;  %v908_v15 = vsel %vm905_vm7, %v891_v27, %v749_v60 }
  0xf4   :  { %v755_v4 = vpop.permute.xlu0 %754 }
  0xf5   :  { %v911_v25 = vsel %vm905_vm7, %v894_v47, %v755_v4 }
  0xf8   :  { %v763_v59 = vpop.permute.xlu1 %762  ;;  %v805_v56 = vpop.permute.xlu2 %804 }
  0xf9   :  { %v915_v2 = vsel %vm905_vm7, %v898_v58, %v763_v59  ;;  %v1949_v11 = vsel %vm922_vm9, %v912_v1, %v805_v56 }
  0xfc   :  { %v761_v0 = vpop.permute.xlu0 %760 }
  0xfd   :  { %v914_v21 = vsel %vm905_vm7, %v897_v57, %v761_v0 }
 0x100   :  { %v769_v28 = vpop.permute.xlu1 %768  ;;  %v811_v3 = vpop.permute.xlu2 %810 }
 0x101   :  { %v918_v9 = vsel %vm905_vm7, %v901_v16, %v769_v28  ;;  %v1955_v14 = vsel %vm922_vm9, %v915_v2, %v811_v3 }
 0x104   :  { %v767_v37 = vpop.permute.xlu0 %766 }
 0x105   :  { %v917_v42 = vsel %vm905_vm7, %v900_v54, %v767_v37 }
 0x108   :  { %v775_v7 = vpop.permute.xlu1 %774  ;;  %v817_v6 = vpop.permute.xlu2 %816 }
 0x109   :  { %v921_v13 = vsel %vm905_vm7, %v904_v31, %v775_v7  ;;  %v1961_v23 = vsel %vm922_vm9, %v918_v9, %v817_v6 }
 0x10c   :  { %v773_v29 = vpop.permute.xlu0 %772 }
 0x10d   :  { %v920_v43 = vsel %vm905_vm7, %v903_v46, %v773_v29 }
 0x110   :  { %v797_v34 = vpop.permute.xlu1 %796  ;;  %v823_v18 = vpop.permute.xlu2 %822 }
 0x111   :  { %v1964_v61 = vsel %vm922_vm9, %v921_v13, %v823_v18  ;;  %v925_v33 = vsel %vm922_vm9, %v908_v15, %v797_v34 }
 0x114   :  { %v795_v30 = vpop.permute.xlu0 %794 }
 0x115   :  { %v924_v16 = vsel %vm922_vm9, %v1876_v26, %v795_v30 }
 0x118   :  { %v803_v8 = vpop.permute.xlu1 %802  ;;  %v845_v10 = vpop.permute.xlu2 %844 }
 0x119   :  { %v942_v32 = vsel %vm939_vm10, %v925_v33, %v845_v10  ;;  %v928_v45 = vsel %vm922_vm9, %v911_v25, %v803_v8 }
 0x11a   :  { %v1973_v12 = vsel %vm956_vm11, %v942_v32, 0.0 }
 0x11b   :  { %v1976_v35 = vmul.f32 0.24420135, %v1973_v12 }
 0x11c   :  { %v801_v22 = vpop.permute.xlu0 %800 }
 0x11d   :  { %1025 = vrot.lane.b32.xlu0 %v1976_v35, %s1431_s16  ;;  %v927_v34 = vsel %vm922_vm9, %v1887_v38, %v801_v22 }
 0x120   :  { %v809_v52 = vpop.permute.xlu1 %808  ;;  %v851_v41 = vpop.permute.xlu2 %850 }
 0x121   :  { %v945_v49 = vsel %vm939_vm10, %v928_v45, %v851_v41  ;;  %v931_v40 = vsel %vm922_vm9, %v914_v21, %v809_v52 }
 0x122   :  { %v1987_v50 = vsel %vm956_vm11, %v945_v49, 0.0 }
 0x123   :  { %v1990_v48 = vmul.f32 0.24420135, %v1987_v50 }
 0x124   :  { %v807_v62 = vpop.permute.xlu0 %806 }
 0x125   :  { %1031 = vrot.lane.b32.xlu0 %v1990_v48, %s1431_s16  ;;  %v930_v32 = vsel %vm922_vm9, %v1898_v36, %v807_v62 }
 0x128   :  { %v815_v20 = vpop.permute.xlu1 %814  ;;  %v857_v24 = vpop.permute.xlu2 %856 }
 0x129   :  { %v948_v60 = vsel %vm939_vm10, %v931_v40, %v857_v24  ;;  %v934_v1 = vsel %vm922_vm9, %v917_v42, %v815_v20 }
 0x12a   :  { %v2001_v63 = vsel %vm956_vm11, %v948_v60, 0.0 }
 0x12b   :  { %v2004_v39 = vmul.f32 0.24420135, %v2001_v63 }
 0x12c   :  { %v813_v53 = vpop.permute.xlu0 %812 }
 0x12d   :  { %1037 = vrot.lane.b32.xlu0 %v2004_v39, %s1431_s16  ;;  %v933_v62 = vsel %vm922_vm9, %v1909_v44, %v813_v53 }
 0x130   :  { %v821_v4 = vpop.permute.xlu1 %820  ;;  %v863_v58 = vpop.permute.xlu2 %862 }
 0x131   :  { %v951_v59 = vsel %vm939_vm10, %v934_v1, %v863_v58  ;;  %v937_v28 = vsel %vm922_vm9, %v920_v43, %v821_v4 }
 0x132   :  { %v2015_v56 = vsel %vm956_vm11, %v951_v59, 0.0 }
 0x133   :  { %v2018_v2 = vmul.f32 0.24420135, %v2015_v56 }
 0x134   :  { %v819_v0 = vpop.permute.xlu0 %818 }
 0x135   :  { %1043 = vrot.lane.b32.xlu0 %v2018_v2, %s1431_s16  ;;  %v936_v54 = vsel %vm922_vm9, %v1923_v55, %v819_v0 }
 0x138   :  { %v843_v3 = vpop.permute.xlu1 %842  ;;  %v869_v9 = vpop.permute.xlu2 %868 }
 0x139   :  { %v941_v37 = vsel %vm939_vm10, %v924_v16, %v843_v3  ;;  %v954_v31 = vsel %vm939_vm10, %v937_v28, %v869_v9 }
 0x13a   :  { %v2032_v7 = vsel %vm956_vm11, %v941_v37, 0.0  ;;  %v2035_v6 = vsel %vm956_vm11, %v954_v31, 0.0 }
 0x13b   :  { %v2038_v5 = vmul.f32 0.24420135, %v2032_v7  ;;  %v2041_v17 = vmul.f32 0.24420135, %v2035_v6  ;;  %v1086_v33 = vmul.f32 0.40261996, %v2032_v7 }
 0x13c   :  { %v841_v26 = vpop.permute.xlu0 %840 }
 0x13d   :  { %1023 = vrot.lane.b32.xlu2 %v2038_v5, %s1431_s16  ;;  %1049 = vrot.lane.b32.xlu0 %v2041_v17, %s1431_s16  ;;  %v940_v13 = vsel %vm939_vm10, %v1933_v51, %v841_v26  ;;  %v1087_v26 = vmul.f32 0.40261996, %v1973_v12 }
 0x13e   :  { %v2050_v29 = vsel %vm956_vm11, %v940_v13, 0.0  ;;  %v1090_v13 = vmul.f32 0.40261996, %v1987_v50 }
 0x13f   :  { %v2055_v18 = vmul.f32 0.24420135, %v2050_v29  ;;  %v1085_v16 = vmul.f32 0.40261996, %v2050_v29 }
 0x140   :  { %v849_v30 = vpop.permute.xlu1 %848 }
 0x141   :  { %v944_v27 = vsel %vm939_vm10, %v927_v34, %v849_v30  ;;  %1021 = vrot.lane.b32.xlu1 %v2055_v18, %s1431_s16 }
 0x142   :  { %v2061_v15 = vsel %vm956_vm11, %v944_v27, 0.0  ;;  %v1096_v27 = vmul.f32 0.40261996, %v2015_v56 }
 0x143   :  { %v2064_v51 = vmul.f32 0.24420135, %v2061_v15 }
 0x144   :  { %v847_v8 = vpop.permute.xlu0 %846 }
 0x145   :  { %1029 = vrot.lane.b32.xlu2 %v2064_v51, %s1431_s16  ;;  %1119 = vrot.lane.b32.xlu0 %v1086_v33, %s1427_s0  ;;  %v943_v38 = vsel %vm939_vm10, %v1941_v19, %v847_v8  ;;  %v1089_v19 = vmul.f32 0.40261996, %v2061_v15  ;;  %v975_v8 = vmul.f32 0.054488685, %v1973_v12 }
 0x146   :  { %v2073_v10 = vsel %vm956_vm11, %v943_v38, 0.0 }
 0x147   :  { %v992_v22 = vmul.f32 0.24420135, %v2073_v10  ;;  %v1088_v31 = vmul.f32 0.40261996, %v2073_v10 }
 0x148   :  { %v855_v47 = vpop.permute.xlu1 %854 }
 0x149   :  { %v947_v25 = vsel %vm939_vm10, %v930_v32, %v855_v47  ;;  %1027 = vrot.lane.b32.xlu1 %v992_v22, %s1431_s16  ;;  %v1099_v32 = vmul.f32 0.40261996, %v2035_v6  ;;  %v974_v47 = vmul.f32 0.054488685, %v2032_v7  ;;  %v981_v7 = vmul.f32 0.054488685, %v2001_v63 }
 0x14a   :  { %v2081_v45 = vsel %vm956_vm11, %v947_v25, 0.0  ;;  %v978_v25 = vmul.f32 0.054488685, %v1987_v50 }
 0x14b   :  { %v2084_v52 = vmul.f32 0.24420135, %v2081_v45 }
 0x14c   :  { %v853_v41 = vpop.permute.xlu0 %852 }
 0x14d   :  { %1035 = vrot.lane.b32.xlu2 %v2084_v52, %s1431_s16  ;;  %1125 = vrot.lane.b32.xlu0 %v1089_v19, %s1427_s0  ;;  %v946_v36 = vsel %vm939_vm10, %v1949_v11, %v853_v41  ;;  %v1092_v11 = vmul.f32 0.40261996, %v2081_v45 }
 0x14e   :  { %v2093_v49 = vsel %vm956_vm11, %v946_v36, 0.0 }
 0x14f   :  { %v995_v57 = vmul.f32 0.24420135, %v2093_v49 }
 0x150   :  { %v861_v21 = vpop.permute.xlu1 %860 }
 0x151   :  { %v950_v40 = vsel %vm939_vm10, %v933_v62, %v861_v21  ;;  %1033 = vrot.lane.b32.xlu1 %v995_v57, %s1431_s16 }
 0x152   :  { %v2101_v20 = vsel %vm956_vm11, %v950_v40, 0.0 }
 0x153   :  { %v2104_v24 = vmul.f32 0.24420135, %v2101_v20 }
 0x154   :  { %v859_v60 = vpop.permute.xlu0 %858 }
 0x155   :  { %1041 = vrot.lane.b32.xlu2 %v2104_v24, %s1431_s16  ;;  %1131 = vrot.lane.b32.xlu0 %v1092_v11, %s1427_s0  ;;  %v949_v44 = vsel %vm939_vm10, %v1955_v14, %v859_v60  ;;  %v1095_v14 = vmul.f32 0.40261996, %v2101_v20 }
 0x156   :  { %v2113_v53 = vsel %vm956_vm11, %v949_v44, 0.0 }
 0x157   :  { %v998_v42 = vmul.f32 0.24420135, %v2113_v53  ;;  %v1094_v34 = vmul.f32 0.40261996, %v2113_v53 }
 0x158   :  { %v867_v1 = vpop.permute.xlu1 %866 }
 0x159   :  { %v953_v4 = vsel %vm939_vm10, %v936_v54, %v867_v1  ;;  %1039 = vrot.lane.b32.xlu1 %v998_v42, %s1431_s16  ;;  %v973_v54 = vmul.f32 0.054488685, %v2050_v29 }
 0x15a   :  { %v2121_v58 = vsel %vm956_vm11, %v953_v4, 0.0 }
 0x15b   :  { %v2124_v59 = vmul.f32 0.24420135, %v2121_v58  ;;  %v1098_v28 = vmul.f32 0.40261996, %v2121_v58 }
 0x15c   :  { %v865_v46 = vpop.permute.xlu0 %864 }
 0x15d   :  { %1047 = vrot.lane.b32.xlu2 %v2124_v59, %s1431_s16  ;;  %1137 = vrot.lane.b32.xlu0 %v1095_v14, %s1427_s0  ;;  %v952_v55 = vsel %vm939_vm10, %v1961_v23, %v865_v46 }
 0x15e   :  { %v2133_v0 = vsel %vm956_vm11, %v952_v55, 0.0 }
 0x15f   :  { %v1001_v43 = vmul.f32 0.24420135, %v2133_v0  ;;  %v1097_v30 = vmul.f32 0.40261996, %v2133_v0 }
 0x161   :  { %1045 = vrot.lane.b32.xlu1 %v1001_v43, %s1431_s16 }
 0x164   :  { %v871_v3 = vpop.permute.xlu0 %870 }
 0x165   :  { %1117 = vrot.lane.b32.xlu2 %v1085_v16, %s1427_s0  ;;  %1143 = vrot.lane.b32.xlu0 %v1098_v28, %s1427_s0  ;;  %v955_v9 = vsel %vm939_vm10, %v1964_v61, %v871_v3  ;;  %v1091_v61 = vmul.f32 0.40261996, %v2093_v49 }
 0x166   :  { %v2144_v23 = vsel %vm956_vm11, %v955_v9, 0.0 }
 0x167   :  { %v1004_v37 = vmul.f32 0.24420135, %v2144_v23  ;;  %v1100_v33 = vmul.f32 0.40261996, %v2144_v23 }
 0x169   :  { %1051 = vrot.lane.b32.xlu1 %v1004_v37, %s1431_s16 }
 0x16d   :  { %1123 = vrot.lane.b32.xlu2 %v1088_v31, %s1427_s0  ;;  %1181 = vrot.lane.b32.xlu0 %v2055_v18, %s1432_s17  ;;  %v1093_v18 = vmul.f32 0.40261996, %v2001_v63 }
 0x171   :  { %1121 = vrot.lane.b32.xlu1 %v1087_v26, %s1427_s0 }
 0x175   :  { %1129 = vrot.lane.b32.xlu2 %v1091_v61, %s1427_s0  ;;  %1187 = vrot.lane.b32.xlu0 %v992_v22, %s1432_s17 }
 0x179   :  { %1127 = vrot.lane.b32.xlu1 %v1090_v13, %s1427_s0 }
 0x17d   :  { %1135 = vrot.lane.b32.xlu2 %v1094_v34, %s1427_s0  ;;  %1193 = vrot.lane.b32.xlu0 %v995_v57, %s1432_s17 }
 0x181   :  { %1133 = vrot.lane.b32.xlu1 %v1093_v18, %s1427_s0  ;;  %v985_v18 = vmul.f32 0.054488685, %v2133_v0 }
 0x185   :  { %1141 = vrot.lane.b32.xlu2 %v1097_v30, %s1427_s0  ;;  %1199 = vrot.lane.b32.xlu0 %v998_v42, %s1432_s17 }
 0x189   :  { %1139 = vrot.lane.b32.xlu1 %v1096_v27, %s1427_s0 }
 0x18d   :  { %1147 = vrot.lane.b32.xlu2 %v1100_v33, %s1427_s0  ;;  %1205 = vrot.lane.b32.xlu0 %v1001_v43, %s1432_s17  ;;  %v979_v43 = vmul.f32 0.054488685, %v2093_v49 }
 0x18f   :  { %v1026_v38 = vpop.permute.xlu0 %1025 }
 0x190   :  { %v2174_v22 = vadd.f32 %v1026_v38, %v975_v8 }
 0x191   :  { %1145 = vrot.lane.b32.xlu1 %v1099_v32, %s1427_s0  ;;  %v988_v32 = vmul.f32 0.054488685, %v2144_v23 }
 0x195   :  { %1185 = vrot.lane.b32.xlu2 %v1976_v35, %s1432_s17  ;;  %1211 = vrot.lane.b32.xlu0 %v1004_v37, %s1432_s17  ;;  %v977_v35 = vmul.f32 0.054488685, %v2061_v15  ;;  %v982_v37 = vmul.f32 0.054488685, %v2113_v53 }
 0x197   :  { %v1024_v19 = vpop.permute.xlu2 %1023  ;;  %v1032_v41 = vpop.permute.xlu0 %1031 }
 0x198   :  { %v1070_v36 = vadd.f32 %v1024_v19, %v974_v47  ;;  %v2182_v12 = vadd.f32 %v1032_v41, %v978_v25 }
 0x199   :  { %1183 = vrot.lane.b32.xlu1 %v2038_v5, %s1432_s17  ;;  %v984_v5 = vmul.f32 0.054488685, %v2015_v56 }
 0x19d   :  { %1191 = vrot.lane.b32.xlu2 %v1990_v48, %s1432_s17  ;;  %1265 = vrot.lane.b32.xlu0 %v975_v8, %s1433_s18  ;;  %v980_v48 = vmul.f32 0.054488685, %v2081_v45 }
 0x19f   :  { %v1030_v62 = vpop.permute.xlu2 %1029  ;;  %v1038_v50 = vpop.permute.xlu0 %1037 }
 0x1a0   :  { %v1073_v57 = vadd.f32 %v1030_v62, %v977_v35  ;;  %v2191_v21 = vadd.f32 %v1038_v50, %v981_v7 }
 0x1a1   :  { %1189 = vrot.lane.b32.xlu1 %v2064_v51, %s1432_s17  ;;  %v987_v51 = vmul.f32 0.054488685, %v2035_v6 }
 0x1a5   :  { %1197 = vrot.lane.b32.xlu2 %v2004_v39, %s1432_s17  ;;  %1271 = vrot.lane.b32.xlu0 %v978_v25, %s1433_s18  ;;  %v983_v39 = vmul.f32 0.054488685, %v2101_v20 }
 0x1a7   :  { %v1036_v15 = vpop.permute.xlu2 %1035  ;;  %v1044_v40 = vpop.permute.xlu0 %1043 }
 0x1a8   :  { %v1076_v63 = vadd.f32 %v1036_v15, %v980_v48  ;;  %v2200_v11 = vadd.f32 %v1044_v40, %v984_v5 }
 0x1a9   :  { %1195 = vrot.lane.b32.xlu1 %v2084_v52, %s1432_s17 }
 0x1ad   :  { %1203 = vrot.lane.b32.xlu2 %v2018_v2, %s1432_s17  ;;  %1277 = vrot.lane.b32.xlu0 %v981_v7, %s1433_s18  ;;  %v986_v2 = vmul.f32 0.054488685, %v2121_v58 }
 0x1af   :  { %v1042_v45 = vpop.permute.xlu2 %1041  ;;  %v1050_v60 = vpop.permute.xlu0 %1049 }
 0x1b0   :  { %v1079_v56 = vadd.f32 %v1042_v45, %v983_v39  ;;  %v2209_v44 = vadd.f32 %v1050_v60, %v987_v51 }
 0x1b1   :  { %1201 = vrot.lane.b32.xlu1 %v2104_v24, %s1432_s17  ;;  %v976_v24 = vmul.f32 0.054488685, %v2073_v10 }
 0x1b3   :  { %v1022_v52 = vpop.permute.xlu1 %1021 }
 0x1b4   :  { %v1069_v42 = vadd.f32 %v1022_v52, %v973_v54 }
 0x1b5   :  { %1209 = vrot.lane.b32.xlu2 %v2041_v17, %s1432_s17  ;;  %1283 = vrot.lane.b32.xlu0 %v984_v5, %s1433_s18 }
 0x1b7   :  { %v1048_v6 = vpop.permute.xlu2 %1047  ;;  %v1120_v20 = vpop.permute.xlu0 %1119 }
 0x1b8   :  { %v1082_v1 = vadd.f32 %v1048_v6, %v986_v2  ;;  %v2218_v4 = vadd.f32 %v1120_v20, %v1070_v36 }
 0x1b9   :  { %1207 = vrot.lane.b32.xlu1 %v2124_v59, %s1432_s17 }
 0x1bb   :  { %v1028_v29 = vpop.permute.xlu1 %1027 }
 0x1bc   :  { %v1072_v14 = vadd.f32 %v1028_v29, %v976_v24 }
 0x1bd   :  { %1263 = vrot.lane.b32.xlu2 %v974_v47, %s1433_s18  ;;  %1289 = vrot.lane.b32.xlu0 %v987_v51, %s1433_s18 }
 0x1bf   :  { %v1118_v17 = vpop.permute.xlu2 %1117  ;;  %v1126_v46 = vpop.permute.xlu0 %1125 }
 0x1c0   :  { %v1165_v55 = vadd.f32 %v1118_v17, %v1069_v42  ;;  %v2225_v58 = vadd.f32 %v1126_v46, %v1073_v57 }
 0x1c1   :  { %1261 = vrot.lane.b32.xlu1 %v973_v54, %s1433_s18 }
 0x1c3   :  { %v1034_v16 = vpop.permute.xlu1 %1033 }
 0x1c4   :  { %v1075_v28 = vadd.f32 %v1034_v16, %v979_v43 }
 0x1c5   :  { %1269 = vrot.lane.b32.xlu2 %v977_v35, %s1433_s18 }
 0x1c7   :  { %v1124_v10 = vpop.permute.xlu2 %1123  ;;  %v1132_v59 = vpop.permute.xlu0 %1131 }
 0x1c8   :  { %v1168_v3 = vadd.f32 %v1124_v10, %v1072_v14  ;;  %v2230_v9 = vadd.f32 %v1132_v59, %v1076_v63 }
 0x1c9   :  { %1267 = vrot.lane.b32.xlu1 %v976_v24, %s1433_s18 }
 0x1cb   :  { %v1040_v31 = vpop.permute.xlu1 %1039 }
 0x1cc   :  { %v1078_v26 = vadd.f32 %v1040_v31, %v982_v37 }
 0x1cd   :  { %1275 = vrot.lane.b32.xlu2 %v980_v48, %s1433_s18 }
 0x1cf   :  { %v1130_v61 = vpop.permute.xlu2 %1129  ;;  %v1138_v13 = vpop.permute.xlu0 %1137 }
 0x1d0   :  { %v1171_v49 = vadd.f32 %v1130_v61, %v1075_v28  ;;  %v2235_v34 = vadd.f32 %v1138_v13, %v1079_v56 }
 0x1d1   :  { %1273 = vrot.lane.b32.xlu1 %v979_v43, %s1433_s18 }
 0x1d3   :  { %v1046_v30 = vpop.permute.xlu1 %1045 }
 0x1d4   :  { %v1081_v27 = vadd.f32 %v1046_v30, %v985_v18 }
 0x1d5   :  { %1281 = vrot.lane.b32.xlu2 %v983_v39, %s1433_s18 }
 0x1d7   :  { %v1136_v33 = vpop.permute.xlu2 %1135  ;;  %v1144_v8 = vpop.permute.xlu0 %1143 }
 0x1d8   :  { %v1174_v53 = vadd.f32 %v1136_v33, %v1078_v26  ;;  %v2240_v38 = vadd.f32 %v1144_v8, %v1082_v1 }
 0x1d9   :  { %1279 = vrot.lane.b32.xlu1 %v982_v37, %s1433_s18 }
 0x1db   :  { %v1052_v47 = vpop.permute.xlu1 %1051 }
 0x1dc   :  { %v1084_v25 = vadd.f32 %v1052_v47, %v988_v32 }
 0x1dd   :  { %1287 = vrot.lane.b32.xlu2 %v986_v2, %s1433_s18 }
 0x1df   :  { %v1142_v19 = vpop.permute.xlu2 %1141  ;;  %v1182_v41 = vpop.permute.xlu0 %1181 }
 0x1e0   :  { %v1177_v0 = vadd.f32 %v1142_v19, %v1081_v27  ;;  %v2245_v36 = vadd.f32 %v1182_v41, %v1165_v55 }
 0x1e1   :  { %1285 = vrot.lane.b32.xlu1 %v985_v18, %s1433_s18 }
 0x1e3   :  { %v1122_v35 = vpop.permute.xlu1 %1121 }
 0x1e4   :  { %v1167_v20 = vadd.f32 %v1122_v35, %v2174_v22 }
 0x1e7   :  { %v1148_v7 = vpop.permute.xlu2 %1147  ;;  %v1188_v62 = vpop.permute.xlu0 %1187 }
 0x1e8   :  { %v1180_v50 = vadd.f32 %v1148_v7, %v1084_v25  ;;  %v2248_v57 = vadd.f32 %v1188_v62, %v1168_v3 }
 0x1e9   :  { %1291 = vrot.lane.b32.xlu1 %v988_v32, %s1433_s18 }
 0x1eb   :  { %v1128_v23 = vpop.permute.xlu1 %1127 }
 0x1ec   :  { %v1170_v46 = vadd.f32 %v1128_v23, %v2182_v12 }
 0x1ef   :  { %v1186_v48 = vpop.permute.xlu2 %1185  ;;  %v1194_v5 = vpop.permute.xlu0 %1193 }
 0x1f0   :  { %v2251_v15 = vadd.f32 %v1194_v5, %v1171_v49  ;;  %v1231_v24 = vadd.f32 %v1186_v48, %v1167_v20 }
 0x1f3   :  { %v1134_v40 = vpop.permute.xlu1 %1133 }
 0x1f4   :  { %v1173_v22 = vadd.f32 %v1134_v40, %v2191_v21 }
 0x1f7   :  { %v1192_v63 = vpop.permute.xlu2 %1191  ;;  %v1200_v39 = vpop.permute.xlu0 %1199 }
 0x1f8   :  { %v2253_v51 = vadd.f32 %v1200_v39, %v1174_v53  ;;  %v1234_v43 = vadd.f32 %v1192_v63, %v1170_v46 }
 0x1fb   :  { %v1140_v45 = vpop.permute.xlu1 %1139 }
 0x1ff   :  { %v1198_v60 = vpop.permute.xlu2 %1197  ;;  %v1206_v56 = vpop.permute.xlu0 %1205 }
 0x200   :  { %v2255_v54 = vadd.f32 %v1206_v56, %v1177_v0  ;;  %v1237_v31 = vadd.f32 %v1198_v60, %v1173_v22 }
 0x203   :  { %v1146_v52 = vpop.permute.xlu1 %1145 }
 0x207   :  { %v1204_v42 = vpop.permute.xlu2 %1203  ;;  %v1212_v2 = vpop.permute.xlu0 %1211 }
 0x208   :  { %v2257_v6 = vadd.f32 %v1212_v2, %v1180_v50 }
 0x20b   :  { %v1184_v1 = vpop.permute.xlu1 %1183 }
 0x20c   :  { %v1230_v16 = vadd.f32 %v1184_v1, %v2218_v4  ;;  %v1176_v4 = vadd.f32 %v1140_v45, %v2200_v11 }
 0x20e   :  { %v1240_v30 = vadd.f32 %v1204_v42, %v1176_v4 }
 0x20f   :  { %v1210_v29 = vpop.permute.xlu2 %1209  ;;  %v1266_v14 = vpop.permute.xlu0 %1265 }
 0x210   :  { %v1311_v17 = vadd.f32 %v1266_v14, %v1231_v24 }
 0x212   :  { %1328 = vst.msk [vmem:[#allocation5 + $0x10] sm:$0xff] %vm1325_vm12, %v1311_v17 }
 0x213   :  { %v1190_v55 = vpop.permute.xlu1 %1189 }
 0x214   :  { %v1233_v26 = vadd.f32 %v1190_v55, %v2225_v58  ;;  %v1179_v58 = vadd.f32 %v1146_v52, %v2209_v44 }
 0x216   :  { %v1243_v47 = vadd.f32 %v1210_v29, %v1179_v58 }
 0x217   :  { %v1264_v28 = vpop.permute.xlu2 %1263  ;;  %v1272_v10 = vpop.permute.xlu0 %1271 }
 0x218   :  { %v1310_v59 = vadd.f32 %v1264_v28, %v1230_v16  ;;  %v1314_v3 = vadd.f32 %v1272_v10, %v1234_v43 }
 0x21a   :  { %1327 = vst.msk [vmem:[#allocation5 + $0x8] sm:$0xff] %vm1325_vm12, %v1310_v59 }
 0x21b   :  { %1331 = vst.msk [vmem:[#allocation5 + $0x28] sm:$0xff] %vm1325_vm12, %v1314_v3  ;;  %v1196_v37 = vpop.permute.xlu1 %1195 }
 0x21c   :  { %v1236_v27 = vadd.f32 %v1196_v37, %v2230_v9 }
 0x21f   :  { %v1270_v61 = vpop.permute.xlu2 %1269  ;;  %v1278_v12 = vpop.permute.xlu0 %1277 }
 0x220   :  { %v1313_v13 = vadd.f32 %v1270_v61, %v1233_v26  ;;  %v1317_v49 = vadd.f32 %v1278_v12, %v1237_v31 }
 0x222   :  { %1330 = vst.msk [vmem:[#allocation5 + $0x20] sm:$0xff] %vm1325_vm12, %v1313_v13 }
 0x223   :  { %1334 = vst.msk [vmem:[#allocation5 + $0x40] sm:$0xff] %vm1325_vm12, %v1317_v49  ;;  %v1202_v18 = vpop.permute.xlu1 %1201 }
 0x224   :  { %v1239_v25 = vadd.f32 %v1202_v18, %v2235_v34 }
 0x227   :  { %v1276_v33 = vpop.permute.xlu2 %1275  ;;  %v1284_v21 = vpop.permute.xlu0 %1283 }
 0x228   :  { %v1316_v8 = vadd.f32 %v1276_v33, %v1236_v27  ;;  %v1320_v53 = vadd.f32 %v1284_v21, %v1240_v30 }
 0x22a   :  { %1333 = vst.msk [vmem:[#allocation5 + $0x38] sm:$0xff] %vm1325_vm12, %v1316_v8 }
 0x22b   :  { %1337 = vst.msk [vmem:[#allocation5 + $0x58] sm:$0xff] %vm1325_vm12, %v1320_v53  ;;  %v1208_v32 = vpop.permute.xlu1 %1207 }
 0x22c   :  { %v1242_v7 = vadd.f32 %v1208_v32, %v2240_v38 }
 0x22f   :  { %v1282_v19 = vpop.permute.xlu2 %1281  ;;  %v1290_v11 = vpop.permute.xlu0 %1289 }
 0x230   :  { %v1319_v41 = vadd.f32 %v1282_v19, %v1239_v25  ;;  %v1323_v0 = vadd.f32 %v1290_v11, %v1243_v47 }
 0x232   :  { %1336 = vst.msk [vmem:[#allocation5 + $0x50] sm:$0xff] %vm1325_vm12, %v1319_v41 }
 0x233   :  { %1340 = vst.msk [vmem:[#allocation5 + $0x70] sm:$0xff] %vm1325_vm12, %v1323_v0  ;;  %v1262_v9 = vpop.permute.xlu1 %1261 }
 0x234   :  { %v1309_v35 = vadd.f32 %v1262_v9, %v2245_v36 }
 0x236   :  { %1326 = vst.msk [vmem:[#allocation5] sm:$0xff] %vm1325_vm12, %v1309_v35 }
 0x237   :  { %v1288_v44 = vpop.permute.xlu2 %1287 }
 0x238   :  { %v1322_v62 = vadd.f32 %v1288_v44, %v1242_v7 }
 0x23a   :  { %1339 = vst.msk [vmem:[#allocation5 + $0x68] sm:$0xff] %vm1325_vm12, %v1322_v62 }
 0x23b   :  { %v1268_v34 = vpop.permute.xlu1 %1267 }
 0x23c   :  { %v1312_v50 = vadd.f32 %v1268_v34, %v2248_v57 }
 0x23e   :  { %1329 = vst.msk [vmem:[#allocation5 + $0x18] sm:$0xff] %vm1325_vm12, %v1312_v50 }
 0x243   :  { %v1274_v23 = vpop.permute.xlu1 %1273 }
 0x244   :  { %v1315_v48 = vadd.f32 %v1274_v23, %v2251_v15 }
 0x246   :  { %1332 = vst.msk [vmem:[#allocation5 + $0x30] sm:$0xff] %vm1325_vm12, %v1315_v48 }
 0x24b   :  { %v1280_v5 = vpop.permute.xlu1 %1279 }
 0x24c   :  { %v1318_v36 = vadd.f32 %v1280_v5, %v2253_v51 }
 0x24e   :  { %1335 = vst.msk [vmem:[#allocation5 + $0x48] sm:$0xff] %vm1325_vm12, %v1318_v36 }
 0x253   :  { %v1286_v38 = vpop.permute.xlu1 %1285 }
 0x254   :  { %v1321_v40 = vadd.f32 %v1286_v38, %v2255_v54 }
 0x256   :  { %1338 = vst.msk [vmem:[#allocation5 + $0x60] sm:$0xff] %vm1325_vm12, %v1321_v40 }
 0x25b   :  { %v1292_v57 = vpop.permute.xlu1 %1291 }
 0x25c   :  { %v1324_v15 = vadd.f32 %v1292_v57, %v2257_v6 }
 0x25e   :  { %1341 = vst.msk [vmem:[#allocation5 + $0x78] sm:$0xff] %vm1325_vm12, %v1324_v15 }
 0x25f   :  { %1354 = dma.vmem_to_hbm [thread:$0]  %s1347_s20, 2048, %s1349_s23, [#allocation4], %s1425_s11, %s1425_s11, %s1426_s12  }
 0x260   :  { %1422 = dma.done.wait [#allocation4], 2048  }
 0x261   :  { %1423 = vsyncadd [#allocation4], 4294965248 }
 0x262   :  { %1359 = vsyncpa [#allocation3], 1 }
 0x263   :  { %1360 = vsyncpa [#allocation4], 1 }

</bundles_post_ra>
